<compile_context>
chip_gen: v7x
topology: tpu7x:2x2x1
jax: 0.10.0
libtpu: 0.0.40
codegen_flags: <defaults>
</compile_context>

<pallas_src>
import functools

import jax
import jax.numpy as jnp
from jax.experimental import pallas as pl
from jax.experimental.pallas import tpu as pltpu


# -----------------------------------------------------------------------------
# Pallas kernel: one (row-block, time-block) tile of the RK4 integration.
# -----------------------------------------------------------------------------
def _rk4_block_kernel(dt_ref,     # SMEM (T,) f32 : dt[0]=0, dt[t]=ts[t]-ts[t-1]
                      x0_ref,     # VMEM (bn, D)  : augmented initial state block
                      w1_ref,     # VMEM (D, H)
                      b1_ref,     # VMEM (1, H)
                      w2_ref,     # VMEM (H, D)
                      b2_ref,     # VMEM (1, D)
                      out_ref,    # VMEM (bn, tb*D) : lane-dense trajectory slab
                      state_ref,  # VMEM (bn, D) f32 scratch : carry across time blocks
                      *, num_chunks, use_bf16_mxu):
    bn, D = x0_ref.shape
    H = w1_ref.shape[1]
    tb = out_ref.shape[1] // D
    cs = bn // num_chunks
    j = pl.program_id(1)          # time-block index (serial / "arbitrary" axis)

    # (Re)initialize the carried state at the start of every trajectory block.
    @pl.when(j == 0)
    def _():
        state_ref[...] = x0_ref[...].astype(jnp.float32)

    # --- Hoist all scalar (SMEM) reads and scalar arithmetic ahead of vector work.
    # dt[0] == 0, so the global t==0 "step" is an exact no-op reproducing x0.
    base = j * tb
    step_scalars = []
    for l in range(tb):
        dt = dt_ref[base + l]
        step_scalars.append((dt, 0.5 * dt, dt * (1.0 / 6.0)))

    # --- Hoist weight loads / casts and bias broadcasts out of the RK4 stages.
    mxu_dtype = jnp.bfloat16 if use_bf16_mxu else jnp.float32
    w1 = w1_ref[...].astype(mxu_dtype)
    w2 = w2_ref[...].astype(mxu_dtype)
    b1 = jnp.broadcast_to(b1_ref[...], (cs, H)).astype(jnp.float32)
    b2 = jnp.broadcast_to(b2_ref[...], (cs, D)).astype(jnp.float32)

    def ode_func(y):
        # bf16 MXU operands, f32 accumulation; bias add / tanh stay f32 (VPU/EUP).
        h = jnp.tanh(jnp.dot(y.astype(mxu_dtype), w1,
                             preferred_element_type=jnp.float32) + b1)
        return jnp.dot(h.astype(mxu_dtype), w2,
                       preferred_element_type=jnp.float32) + b2

    # Independent row chunks: interleaving their RK4 chains stage-by-stage lets the
    # scheduler overlap MXU push/pop and EUP FIFO latency across chunks.
    states = [state_ref[pl.ds(c * cs, cs), :] for c in range(num_chunks)]
    recorded = [[] for _ in range(num_chunks)]

    for l in range(tb):           # static unroll, bounded by the time-block size
        dt, half_dt, sixth_dt = step_scalars[l]
        k1 = [ode_func(s) for s in states]
        k2 = [ode_func(s + half_dt * k) for s, k in zip(states, k1)]
        k3 = [ode_func(s + half_dt * k) for s, k in zip(states, k2)]
        k4 = [ode_func(s + dt * k) for s, k in zip(states, k3)]
        states = [s + sixth_dt * (a + 2.0 * b + 2.0 * c + d)
                  for s, a, b, c, d in zip(states, k1, k2, k3, k4)]
        for c in range(num_chunks):
            recorded[c].append(states[c])

    # Single lane-dense store per chunk of the whole (cs, tb*D) slab, plus the
    # state carry for the next time block.
    for c in range(num_chunks):
        slab = jnp.concatenate(recorded[c], axis=1)          # (cs, tb*D)
        out_ref[pl.ds(c * cs, cs), :] = slab
        state_ref[pl.ds(c * cs, cs), :] = states[c]


def _odeint_pallas(x0, dt, w1, b1, w2, b2, *,
                   block_n=256, max_time_unroll=16, use_bf16_mxu=True):
    """x0: (N, D) f32; dt: (T,) f32 -> (N, T*D) f32 lane-dense trajectory."""
    N, D = x0.shape
    T = dt.shape[0]
    H = w1.shape[1]

    # Row blocking: one block when N is small; otherwise 256-row blocks (matches the
    # v6e/v7x MXU row dimension) if they tile N evenly.
    bn = block_n if (N > block_n and N % block_n == 0) else N

    # Time blocking: single block for small T; otherwise a divisor of T whose block
    # width (tb*D) stays a multiple of 128 lanes, bounding the static unroll.
    if T <= max_time_unroll:
        tb = T
    else:
        tb = T   # fallback: full unroll in one block
        for cand in range(max_time_unroll, 0, -1):
            if T % cand == 0 and (cand * D) % 128 == 0:
                tb = cand
                break

    # Interleave independent row-chunks only when there are enough rows per block.
    num_chunks = 2 if bn >= 16 else 1

    grid = (N // bn, T // tb)

    # Advisory cost hint (2 matmuls per RK4 stage, 4 stages per step, T steps).
    flops = T * 4 * 2 * (N * D * H + N * H * D)
    transcendentals = T * 4 * N * H
    bytes_accessed = 4 * (N * D + T + D * H + H + H * D + D + N * T * D)

    kernel = functools.partial(_rk4_block_kernel,
                               num_chunks=num_chunks,
                               use_bf16_mxu=use_bf16_mxu)

    grid_spec = pltpu.PrefetchScalarGridSpec(
        num_scalar_prefetch=1,                      # dt -> SMEM
        grid=grid,
        in_specs=[
            pl.BlockSpec((bn, D), lambda i, j, dt_ref: (i, 0)),   # x0
            pl.BlockSpec((D, H), lambda i, j, dt_ref: (0, 0)),    # w1 (resident)
            pl.BlockSpec((1, H), lambda i, j, dt_ref: (0, 0)),    # b1
            pl.BlockSpec((H, D), lambda i, j, dt_ref: (0, 0)),    # w2
            pl.BlockSpec((1, D), lambda i, j, dt_ref: (0, 0)),    # b2
        ],
        out_specs=pl.BlockSpec((bn, tb * D), lambda i, j, dt_ref: (i, j)),
        scratch_shapes=[pltpu.VMEM((bn, D), jnp.float32)],        # state carry
    )

    return pl.pallas_call(
        kernel,
        out_shape=jax.ShapeDtypeStruct((N, T * D), jnp.float32),
        grid_spec=grid_spec,
        compiler_params=pltpu.CompilerParams(
            dimension_semantics=("parallel", "arbitrary")),
        cost_estimate=pl.CostEstimate(
            flops=flops,
            transcendentals=transcendentals,
            bytes_accessed=bytes_accessed,
        ),
    )(dt, x0, w1, b1, w2, b2)


# -----------------------------------------------------------------------------
# Module-level wrapper == DiffeqSolver_augmented.forward
# -----------------------------------------------------------------------------
def diffeq_solver_augmented_forward(first_point, time_steps_to_predict, params):
    """
    first_point:            (n_traj_samples, n_traj, dims) f32
    time_steps_to_predict:  (T,) f32
    returns pred_y:         (n_traj_samples, n_traj, T, dims + 5) f32
    """
    traj, batch, dims = first_point.shape
    aug = jnp.zeros((traj, batch, 5), dtype=first_point.dtype)
    first_point_aug = jnp.concatenate([first_point, aug], axis=2)   # (traj, batch, D)
    D = dims + 5
    N = traj * batch
    T = time_steps_to_predict.shape[0]

    x0 = first_point_aug.reshape(N, D).astype(jnp.float32)
    ts = time_steps_to_predict.astype(jnp.float32)
    # dt[0] = 0 so the first integration "step" is an exact identity.
    dt = jnp.concatenate([jnp.zeros((1,), jnp.float32), jnp.diff(ts)])

    traj_flat = _odeint_pallas(x0, dt, params["w1"], params["b1"],
                               params["w2"], params["b2"])          # (N, T*D)

    # The kernel writes the time axis contiguously along lanes per (traj*batch) row,
    # so the target (traj, batch, T, D) layout is a pure reshape (no transpose).
    pred_y = traj_flat.reshape(traj, batch, T, D)
    return pred_y, first_point_aug


if __name__ == "__main__":
    # Small shapes consistent with the module's forward.
    n_traj_samples, n_traj, dims = 2, 4, 11   # -> augmented D = 16
    D = dims + 5
    H = 32                                    # ode_func hidden size
    T = 8                                     # number of prediction time steps

    key = jax.random.PRNGKey(0)
    k_fp, k_w1, k_b1, k_w2, k_b2 = jax.random.split(key, 5)

    first_point = jax.random.normal(k_fp, (n_traj_samples, n_traj, dims), jnp.float32)
    time_steps = jnp.linspace(0.0, 1.0, T, dtype=jnp.float32)

    # Deterministic synthetic ode_func parameters (Linear-tanh-Linear).
    params = {
        "w1": 0.2 * jax.random.normal(k_w1, (D, H), jnp.float32),
        "b1": 0.1 * jax.random.normal(k_b1, (1, H), jnp.float32),
        "w2": 0.2 * jax.random.normal(k_w2, (H, D), jnp.float32),
        "b2": 0.1 * jax.random.normal(k_b2, (1, D), jnp.float32),
    }

    pred_y, first_point_aug = jax.jit(diffeq_solver_augmented_forward)(
        first_point, time_steps, params
    )
    pred_y = jax.block_until_ready(pred_y)

    # Mirror the module's checks (first-point identity + shape + finiteness).
    assert pred_y.shape == (n_traj_samples, n_traj, T, D)
    assert float(jnp.max(jnp.abs(pred_y[:, :, 0, :] - first_point_aug))) < 0.001
    assert bool(jnp.all(jnp.isfinite(pred_y)))

    print("KERNEL_OK")
</pallas_src>

<mosaic_0001>
module attributes {stable_mosaic.version = 11 : i64} {
  func.func @_rk4_block_kernel(%arg0: i32, %arg1: i32, %arg2: memref<8xf32, #tpu.memory_space<smem>>, %arg3: memref<8x16xf32, #tpu.memory_space<vmem>>, %arg4: memref<16x32xf32, #tpu.memory_space<vmem>>, %arg5: memref<1x32xf32, #tpu.memory_space<vmem>>, %arg6: memref<32x16xf32, #tpu.memory_space<vmem>>, %arg7: memref<1x16xf32, #tpu.memory_space<vmem>>, %arg8: memref<8x128xf32, #tpu.memory_space<vmem>>, %arg9: memref<8x16xf32, #tpu.memory_space<vmem>>) attributes {dimension_semantics = [#tpu.dimension_semantics<parallel>, #tpu.dimension_semantics<arbitrary>], iteration_bounds = array<i64: 1, 1>, scalar_prefetch = 1 : i64, scratch_operands = 1 : i64, tpu.core_type = #tpu.core_type<tc>, window_params = [{transform_indices = @transform_0, window_bounds = array<i64: 8, 16>}, {pipeline_mode = #tpu.pipeline_mode<synchronous>, transform_indices = @transform_1, window_bounds = array<i64: 16, 32>}, {pipeline_mode = #tpu.pipeline_mode<synchronous>, transform_indices = @transform_2, window_bounds = array<i64: 1, 32>}, {pipeline_mode = #tpu.pipeline_mode<synchronous>, transform_indices = @transform_3, window_bounds = array<i64: 32, 16>}, {pipeline_mode = #tpu.pipeline_mode<synchronous>, transform_indices = @transform_4, window_bounds = array<i64: 1, 16>}, {transform_indices = @transform_5, window_bounds = array<i64: 8, 128>}]} {
    %c0_i32 = arith.constant 0 : i32
    %0 = arith.cmpi eq, %arg1, %c0_i32 : i32
    %1 = arith.extui %0 : i1 to i32
    %c0_i32_0 = arith.constant 0 : i32
    %2 = arith.cmpi ne, %1, %c0_i32_0 : i32
    scf.if %2 {
      %c0_110 = arith.constant 0 : index
      %c0_111 = arith.constant 0 : index
      %434 = vector.load %arg3[%c0_110, %c0_111] : memref<8x16xf32, #tpu.memory_space<vmem>>, vector<8x16xf32>
      %c0_112 = arith.constant 0 : index
      %c0_113 = arith.constant 0 : index
      %435 = vector.load %arg9[%c0_112, %c0_113] : memref<8x16xf32, #tpu.memory_space<vmem>>, vector<8x16xf32>
      tpu.vector_store %arg9[%c0_112, %c0_113], %434 {strides = array<i32>} : memref<8x16xf32, #tpu.memory_space<vmem>>, vector<8x16xf32>,
    } else {
    }
    %c8_i32 = arith.constant 8 : i32
    %3 = arith.muli %arg1, %c8_i32 : i32
    %c0_i32_1 = arith.constant 0 : i32
    %4 = arith.addi %3, %c0_i32_1 : i32
    %5 = arith.index_cast %4 : i32 to index
    %6 = memref.load %arg2[%5] : memref<8xf32, #tpu.memory_space<smem>>
    %cst = arith.constant 5.000000e-01 : f32
    %7 = arith.mulf %cst, %6 : f32
    %cst_2 = arith.constant 0.166666672 : f32
    %8 = arith.mulf %6, %cst_2 : f32
    %c1_i32 = arith.constant 1 : i32
    %9 = arith.addi %3, %c1_i32 : i32
    %10 = arith.index_cast %9 : i32 to index
    %11 = memref.load %arg2[%10] : memref<8xf32, #tpu.memory_space<smem>>
    %cst_3 = arith.constant 5.000000e-01 : f32
    %12 = arith.mulf %cst_3, %11 : f32
    %cst_4 = arith.constant 0.166666672 : f32
    %13 = arith.mulf %11, %cst_4 : f32
    %c2_i32 = arith.constant 2 : i32
    %14 = arith.addi %3, %c2_i32 : i32
    %15 = arith.index_cast %14 : i32 to index
    %16 = memref.load %arg2[%15] : memref<8xf32, #tpu.memory_space<smem>>
    %cst_5 = arith.constant 5.000000e-01 : f32
    %17 = arith.mulf %cst_5, %16 : f32
    %cst_6 = arith.constant 0.166666672 : f32
    %18 = arith.mulf %16, %cst_6 : f32
    %c3_i32 = arith.constant 3 : i32
    %19 = arith.addi %3, %c3_i32 : i32
    %20 = arith.index_cast %19 : i32 to index
    %21 = memref.load %arg2[%20] : memref<8xf32, #tpu.memory_space<smem>>
    %cst_7 = arith.constant 5.000000e-01 : f32
    %22 = arith.mulf %cst_7, %21 : f32
    %cst_8 = arith.constant 0.166666672 : f32
    %23 = arith.mulf %21, %cst_8 : f32
    %c4_i32 = arith.constant 4 : i32
    %24 = arith.addi %3, %c4_i32 : i32
    %25 = arith.index_cast %24 : i32 to index
    %26 = memref.load %arg2[%25] : memref<8xf32, #tpu.memory_space<smem>>
    %cst_9 = arith.constant 5.000000e-01 : f32
    %27 = arith.mulf %cst_9, %26 : f32
    %cst_10 = arith.constant 0.166666672 : f32
    %28 = arith.mulf %26, %cst_10 : f32
    %c5_i32 = arith.constant 5 : i32
    %29 = arith.addi %3, %c5_i32 : i32
    %30 = arith.index_cast %29 : i32 to index
    %31 = memref.load %arg2[%30] : memref<8xf32, #tpu.memory_space<smem>>
    %cst_11 = arith.constant 5.000000e-01 : f32
    %32 = arith.mulf %cst_11, %31 : f32
    %cst_12 = arith.constant 0.166666672 : f32
    %33 = arith.mulf %31, %cst_12 : f32
    %c6_i32 = arith.constant 6 : i32
    %34 = arith.addi %3, %c6_i32 : i32
    %35 = arith.index_cast %34 : i32 to index
    %36 = memref.load %arg2[%35] : memref<8xf32, #tpu.memory_space<smem>>
    %cst_13 = arith.constant 5.000000e-01 : f32
    %37 = arith.mulf %cst_13, %36 : f32
    %cst_14 = arith.constant 0.166666672 : f32
    %38 = arith.mulf %36, %cst_14 : f32
    %c7_i32 = arith.constant 7 : i32
    %39 = arith.addi %3, %c7_i32 : i32
    %40 = arith.index_cast %39 : i32 to index
    %41 = memref.load %arg2[%40] : memref<8xf32, #tpu.memory_space<smem>>
    %cst_15 = arith.constant 5.000000e-01 : f32
    %42 = arith.mulf %cst_15, %41 : f32
    %cst_16 = arith.constant 0.166666672 : f32
    %43 = arith.mulf %41, %cst_16 : f32
    %c0 = arith.constant 0 : index
    %c0_17 = arith.constant 0 : index
    %44 = vector.load %arg4[%c0, %c0_17] : memref<16x32xf32, #tpu.memory_space<vmem>>, vector<16x32xf32>
    %45 = arith.truncf %44 : vector<16x32xf32> to vector<16x32xbf16>
    %c0_18 = arith.constant 0 : index
    %c0_19 = arith.constant 0 : index
    %46 = vector.load %arg6[%c0_18, %c0_19] : memref<32x16xf32, #tpu.memory_space<vmem>>, vector<32x16xf32>
    %47 = arith.truncf %46 : vector<32x16xf32> to vector<32x16xbf16>
    %c0_20 = arith.constant 0 : index
    %c0_21 = arith.constant 0 : index
    %48 = vector.load %arg5[%c0_20, %c0_21] : memref<1x32xf32, #tpu.memory_space<vmem>>, vector<1x32xf32>
    %49 = vector.shape_cast %48 : vector<1x32xf32> to vector<1x32xf32>
    %50 = vector.broadcast %49 : vector<1x32xf32> to vector<8x32xf32>
    %c0_22 = arith.constant 0 : index
    %c0_23 = arith.constant 0 : index
    %51 = vector.load %arg7[%c0_22, %c0_23] : memref<1x16xf32, #tpu.memory_space<vmem>>, vector<1x16xf32>
    %52 = vector.shape_cast %51 : vector<1x16xf32> to vector<1x16xf32>
    %53 = vector.broadcast %52 : vector<1x16xf32> to vector<8x16xf32>
    %c0_24 = arith.constant 0 : index
    %c0_25 = arith.constant 0 : index
    %54 = vector.load %arg9[%c0_24, %c0_25] : memref<8x16xf32, #tpu.memory_space<vmem>>, vector<8x16xf32>
    %55 = arith.truncf %54 : vector<8x16xf32> to vector<8x16xbf16>
    %cst_26 = arith.constant dense<0.000000e+00> : vector<8x32xf32>
    %56 = tpu.matmul %55, %45, %cst_26 {dimension_numbers = #tpu.dot_dimension_numbers<[1], [0], [0], [1], [0, 0, 1, 1], [], []>} : vector<8x16xbf16>, vector<16x32xbf16>, vector<8x32xf32> -> vector<8x32xf32>
    %57 = arith.addf %56, %50 : vector<8x32xf32>
    %58 = math.tanh %57 : vector<8x32xf32>
    %59 = arith.truncf %58 : vector<8x32xf32> to vector<8x32xbf16>
    %cst_27 = arith.constant dense<0.000000e+00> : vector<8x16xf32>
    %60 = tpu.matmul %59, %47, %cst_27 {dimension_numbers = #tpu.dot_dimension_numbers<[1], [0], [0], [1], [0, 0, 1, 1], [], []>} : vector<8x32xbf16>, vector<32x16xbf16>, vector<8x16xf32> -> vector<8x16xf32>
    %61 = arith.addf %60, %53 : vector<8x16xf32>
    %62 = vector.broadcast %7 : f32 to vector<8x16xf32>
    %63 = arith.mulf %62, %61 : vector<8x16xf32>
    %64 = arith.addf %54, %63 : vector<8x16xf32>
    %65 = arith.truncf %64 : vector<8x16xf32> to vector<8x16xbf16>
    %cst_28 = arith.constant dense<0.000000e+00> : vector<8x32xf32>
    %66 = tpu.matmul %65, %45, %cst_28 {dimension_numbers = #tpu.dot_dimension_numbers<[1], [0], [0], [1], [0, 0, 1, 1], [], []>} : vector<8x16xbf16>, vector<16x32xbf16>, vector<8x32xf32> -> vector<8x32xf32>
    %67 = arith.addf %66, %50 : vector<8x32xf32>
    %68 = math.tanh %67 : vector<8x32xf32>
    %69 = arith.truncf %68 : vector<8x32xf32> to vector<8x32xbf16>
    %cst_29 = arith.constant dense<0.000000e+00> : vector<8x16xf32>
    %70 = tpu.matmul %69, %47, %cst_29 {dimension_numbers = #tpu.dot_dimension_numbers<[1], [0], [0], [1], [0, 0, 1, 1], [], []>} : vector<8x32xbf16>, vector<32x16xbf16>, vector<8x16xf32> -> vector<8x16xf32>
    %71 = arith.addf %70, %53 : vector<8x16xf32>
    %72 = vector.broadcast %7 : f32 to vector<8x16xf32>
    %73 = arith.mulf %72, %71 : vector<8x16xf32>
    %74 = arith.addf %54, %73 : vector<8x16xf32>
    %75 = arith.truncf %74 : vector<8x16xf32> to vector<8x16xbf16>
    %cst_30 = arith.constant dense<0.000000e+00> : vector<8x32xf32>
    %76 = tpu.matmul %75, %45, %cst_30 {dimension_numbers = #tpu.dot_dimension_numbers<[1], [0], [0], [1], [0, 0, 1, 1], [], []>} : vector<8x16xbf16>, vector<16x32xbf16>, vector<8x32xf32> -> vector<8x32xf32>
    %77 = arith.addf %76, %50 : vector<8x32xf32>
    %78 = math.tanh %77 : vector<8x32xf32>
    %79 = arith.truncf %78 : vector<8x32xf32> to vector<8x32xbf16>
    %cst_31 = arith.constant dense<0.000000e+00> : vector<8x16xf32>
    %80 = tpu.matmul %79, %47, %cst_31 {dimension_numbers = #tpu.dot_dimension_numbers<[1], [0], [0], [1], [0, 0, 1, 1], [], []>} : vector<8x32xbf16>, vector<32x16xbf16>, vector<8x16xf32> -> vector<8x16xf32>
    %81 = arith.addf %80, %53 : vector<8x16xf32>
    %82 = vector.broadcast %6 : f32 to vector<8x16xf32>
    %83 = arith.mulf %82, %81 : vector<8x16xf32>
    %84 = arith.addf %54, %83 : vector<8x16xf32>
    %85 = arith.truncf %84 : vector<8x16xf32> to vector<8x16xbf16>
    %cst_32 = arith.constant dense<0.000000e+00> : vector<8x32xf32>
    %86 = tpu.matmul %85, %45, %cst_32 {dimension_numbers = #tpu.dot_dimension_numbers<[1], [0], [0], [1], [0, 0, 1, 1], [], []>} : vector<8x16xbf16>, vector<16x32xbf16>, vector<8x32xf32> -> vector<8x32xf32>
    %87 = arith.addf %86, %50 : vector<8x32xf32>
    %88 = math.tanh %87 : vector<8x32xf32>
    %89 = arith.truncf %88 : vector<8x32xf32> to vector<8x32xbf16>
    %cst_33 = arith.constant dense<0.000000e+00> : vector<8x16xf32>
    %90 = tpu.matmul %89, %47, %cst_33 {dimension_numbers = #tpu.dot_dimension_numbers<[1], [0], [0], [1], [0, 0, 1, 1], [], []>} : vector<8x32xbf16>, vector<32x16xbf16>, vector<8x16xf32> -> vector<8x16xf32>
    %91 = arith.addf %90, %53 : vector<8x16xf32>
    %cst_34 = arith.constant 2.000000e+00 : f32
    %92 = vector.broadcast %cst_34 : f32 to vector<8x16xf32>
    %93 = arith.mulf %92, %71 : vector<8x16xf32>
    %94 = arith.addf %61, %93 : vector<8x16xf32>
    %cst_35 = arith.constant 2.000000e+00 : f32
    %95 = vector.broadcast %cst_35 : f32 to vector<8x16xf32>
    %96 = arith.mulf %95, %81 : vector<8x16xf32>
    %97 = arith.addf %94, %96 : vector<8x16xf32>
    %98 = arith.addf %97, %91 : vector<8x16xf32>
    %99 = vector.broadcast %8 : f32 to vector<8x16xf32>
    %100 = arith.mulf %99, %98 : vector<8x16xf32>
    %101 = arith.addf %54, %100 : vector<8x16xf32>
    %102 = arith.truncf %101 : vector<8x16xf32> to vector<8x16xbf16>
    %cst_36 = arith.constant dense<0.000000e+00> : vector<8x32xf32>
    %103 = tpu.matmul %102, %45, %cst_36 {dimension_numbers = #tpu.dot_dimension_numbers<[1], [0], [0], [1], [0, 0, 1, 1], [], []>} : vector<8x16xbf16>, vector<16x32xbf16>, vector<8x32xf32> -> vector<8x32xf32>
    %104 = arith.addf %103, %50 : vector<8x32xf32>
    %105 = math.tanh %104 : vector<8x32xf32>
    %106 = arith.truncf %105 : vector<8x32xf32> to vector<8x32xbf16>
    %cst_37 = arith.constant dense<0.000000e+00> : vector<8x16xf32>
    %107 = tpu.matmul %106, %47, %cst_37 {dimension_numbers = #tpu.dot_dimension_numbers<[1], [0], [0], [1], [0, 0, 1, 1], [], []>} : vector<8x32xbf16>, vector<32x16xbf16>, vector<8x16xf32> -> vector<8x16xf32>
    %108 = arith.addf %107, %53 : vector<8x16xf32>
    %109 = vector.broadcast %12 : f32 to vector<8x16xf32>
    %110 = arith.mulf %109, %108 : vector<8x16xf32>
    %111 = arith.addf %101, %110 : vector<8x16xf32>
    %112 = arith.truncf %111 : vector<8x16xf32> to vector<8x16xbf16>
    %cst_38 = arith.constant dense<0.000000e+00> : vector<8x32xf32>
    %113 = tpu.matmul %112, %45, %cst_38 {dimension_numbers = #tpu.dot_dimension_numbers<[1], [0], [0], [1], [0, 0, 1, 1], [], []>} : vector<8x16xbf16>, vector<16x32xbf16>, vector<8x32xf32> -> vector<8x32xf32>
    %114 = arith.addf %113, %50 : vector<8x32xf32>
    %115 = math.tanh %114 : vector<8x32xf32>
    %116 = arith.truncf %115 : vector<8x32xf32> to vector<8x32xbf16>
    %cst_39 = arith.constant dense<0.000000e+00> : vector<8x16xf32>
    %117 = tpu.matmul %116, %47, %cst_39 {dimension_numbers = #tpu.dot_dimension_numbers<[1], [0], [0], [1], [0, 0, 1, 1], [], []>} : vector<8x32xbf16>, vector<32x16xbf16>, vector<8x16xf32> -> vector<8x16xf32>
    %118 = arith.addf %117, %53 : vector<8x16xf32>
    %119 = vector.broadcast %12 : f32 to vector<8x16xf32>
    %120 = arith.mulf %119, %118 : vector<8x16xf32>
    %121 = arith.addf %101, %120 : vector<8x16xf32>
    %122 = arith.truncf %121 : vector<8x16xf32> to vector<8x16xbf16>
    %cst_40 = arith.constant dense<0.000000e+00> : vector<8x32xf32>
    %123 = tpu.matmul %122, %45, %cst_40 {dimension_numbers = #tpu.dot_dimension_numbers<[1], [0], [0], [1], [0, 0, 1, 1], [], []>} : vector<8x16xbf16>, vector<16x32xbf16>, vector<8x32xf32> -> vector<8x32xf32>
    %124 = arith.addf %123, %50 : vector<8x32xf32>
    %125 = math.tanh %124 : vector<8x32xf32>
    %126 = arith.truncf %125 : vector<8x32xf32> to vector<8x32xbf16>
    %cst_41 = arith.constant dense<0.000000e+00> : vector<8x16xf32>
    %127 = tpu.matmul %126, %47, %cst_41 {dimension_numbers = #tpu.dot_dimension_numbers<[1], [0], [0], [1], [0, 0, 1, 1], [], []>} : vector<8x32xbf16>, vector<32x16xbf16>, vector<8x16xf32> -> vector<8x16xf32>
    %128 = arith.addf %127, %53 : vector<8x16xf32>
    %129 = vector.broadcast %11 : f32 to vector<8x16xf32>
    %130 = arith.mulf %129, %128 : vector<8x16xf32>
    %131 = arith.addf %101, %130 : vector<8x16xf32>
    %132 = arith.truncf %131 : vector<8x16xf32> to vector<8x16xbf16>
    %cst_42 = arith.constant dense<0.000000e+00> : vector<8x32xf32>
    %133 = tpu.matmul %132, %45, %cst_42 {dimension_numbers = #tpu.dot_dimension_numbers<[1], [0], [0], [1], [0, 0, 1, 1], [], []>} : vector<8x16xbf16>, vector<16x32xbf16>, vector<8x32xf32> -> vector<8x32xf32>
    %134 = arith.addf %133, %50 : vector<8x32xf32>
    %135 = math.tanh %134 : vector<8x32xf32>
    %136 = arith.truncf %135 : vector<8x32xf32> to vector<8x32xbf16>
    %cst_43 = arith.constant dense<0.000000e+00> : vector<8x16xf32>
    %137 = tpu.matmul %136, %47, %cst_43 {dimension_numbers = #tpu.dot_dimension_numbers<[1], [0], [0], [1], [0, 0, 1, 1], [], []>} : vector<8x32xbf16>, vector<32x16xbf16>, vector<8x16xf32> -> vector<8x16xf32>
    %138 = arith.addf %137, %53 : vector<8x16xf32>
    %cst_44 = arith.constant 2.000000e+00 : f32
    %139 = vector.broadcast %cst_44 : f32 to vector<8x16xf32>
    %140 = arith.mulf %139, %118 : vector<8x16xf32>
    %141 = arith.addf %108, %140 : vector<8x16xf32>
    %cst_45 = arith.constant 2.000000e+00 : f32
    %142 = vector.broadcast %cst_45 : f32 to vector<8x16xf32>
    %143 = arith.mulf %142, %128 : vector<8x16xf32>
    %144 = arith.addf %141, %143 : vector<8x16xf32>
    %145 = arith.addf %144, %138 : vector<8x16xf32>
    %146 = vector.broadcast %13 : f32 to vector<8x16xf32>
    %147 = arith.mulf %146, %145 : vector<8x16xf32>
    %148 = arith.addf %101, %147 : vector<8x16xf32>
    %149 = arith.truncf %148 : vector<8x16xf32> to vector<8x16xbf16>
    %cst_46 = arith.constant dense<0.000000e+00> : vector<8x32xf32>
    %150 = tpu.matmul %149, %45, %cst_46 {dimension_numbers = #tpu.dot_dimension_numbers<[1], [0], [0], [1], [0, 0, 1, 1], [], []>} : vector<8x16xbf16>, vector<16x32xbf16>, vector<8x32xf32> -> vector<8x32xf32>
    %151 = arith.addf %150, %50 : vector<8x32xf32>
    %152 = math.tanh %151 : vector<8x32xf32>
    %153 = arith.truncf %152 : vector<8x32xf32> to vector<8x32xbf16>
    %cst_47 = arith.constant dense<0.000000e+00> : vector<8x16xf32>
    %154 = tpu.matmul %153, %47, %cst_47 {dimension_numbers = #tpu.dot_dimension_numbers<[1], [0], [0], [1], [0, 0, 1, 1], [], []>} : vector<8x32xbf16>, vector<32x16xbf16>, vector<8x16xf32> -> vector<8x16xf32>
    %155 = arith.addf %154, %53 : vector<8x16xf32>
    %156 = vector.broadcast %17 : f32 to vector<8x16xf32>
    %157 = arith.mulf %156, %155 : vector<8x16xf32>
    %158 = arith.addf %148, %157 : vector<8x16xf32>
    %159 = arith.truncf %158 : vector<8x16xf32> to vector<8x16xbf16>
    %cst_48 = arith.constant dense<0.000000e+00> : vector<8x32xf32>
    %160 = tpu.matmul %159, %45, %cst_48 {dimension_numbers = #tpu.dot_dimension_numbers<[1], [0], [0], [1], [0, 0, 1, 1], [], []>} : vector<8x16xbf16>, vector<16x32xbf16>, vector<8x32xf32> -> vector<8x32xf32>
    %161 = arith.addf %160, %50 : vector<8x32xf32>
    %162 = math.tanh %161 : vector<8x32xf32>
    %163 = arith.truncf %162 : vector<8x32xf32> to vector<8x32xbf16>
    %cst_49 = arith.constant dense<0.000000e+00> : vector<8x16xf32>
    %164 = tpu.matmul %163, %47, %cst_49 {dimension_numbers = #tpu.dot_dimension_numbers<[1], [0], [0], [1], [0, 0, 1, 1], [], []>} : vector<8x32xbf16>, vector<32x16xbf16>, vector<8x16xf32> -> vector<8x16xf32>
    %165 = arith.addf %164, %53 : vector<8x16xf32>
    %166 = vector.broadcast %17 : f32 to vector<8x16xf32>
    %167 = arith.mulf %166, %165 : vector<8x16xf32>
    %168 = arith.addf %148, %167 : vector<8x16xf32>
    %169 = arith.truncf %168 : vector<8x16xf32> to vector<8x16xbf16>
    %cst_50 = arith.constant dense<0.000000e+00> : vector<8x32xf32>
    %170 = tpu.matmul %169, %45, %cst_50 {dimension_numbers = #tpu.dot_dimension_numbers<[1], [0], [0], [1], [0, 0, 1, 1], [], []>} : vector<8x16xbf16>, vector<16x32xbf16>, vector<8x32xf32> -> vector<8x32xf32>
    %171 = arith.addf %170, %50 : vector<8x32xf32>
    %172 = math.tanh %171 : vector<8x32xf32>
    %173 = arith.truncf %172 : vector<8x32xf32> to vector<8x32xbf16>
    %cst_51 = arith.constant dense<0.000000e+00> : vector<8x16xf32>
    %174 = tpu.matmul %173, %47, %cst_51 {dimension_numbers = #tpu.dot_dimension_numbers<[1], [0], [0], [1], [0, 0, 1, 1], [], []>} : vector<8x32xbf16>, vector<32x16xbf16>, vector<8x16xf32> -> vector<8x16xf32>
    %175 = arith.addf %174, %53 : vector<8x16xf32>
    %176 = vector.broadcast %16 : f32 to vector<8x16xf32>
    %177 = arith.mulf %176, %175 : vector<8x16xf32>
    %178 = arith.addf %148, %177 : vector<8x16xf32>
    %179 = arith.truncf %178 : vector<8x16xf32> to vector<8x16xbf16>
    %cst_52 = arith.constant dense<0.000000e+00> : vector<8x32xf32>
    %180 = tpu.matmul %179, %45, %cst_52 {dimension_numbers = #tpu.dot_dimension_numbers<[1], [0], [0], [1], [0, 0, 1, 1], [], []>} : vector<8x16xbf16>, vector<16x32xbf16>, vector<8x32xf32> -> vector<8x32xf32>
    %181 = arith.addf %180, %50 : vector<8x32xf32>
    %182 = math.tanh %181 : vector<8x32xf32>
    %183 = arith.truncf %182 : vector<8x32xf32> to vector<8x32xbf16>
    %cst_53 = arith.constant dense<0.000000e+00> : vector<8x16xf32>
    %184 = tpu.matmul %183, %47, %cst_53 {dimension_numbers = #tpu.dot_dimension_numbers<[1], [0], [0], [1], [0, 0, 1, 1], [], []>} : vector<8x32xbf16>, vector<32x16xbf16>, vector<8x16xf32> -> vector<8x16xf32>
    %185 = arith.addf %184, %53 : vector<8x16xf32>
    %cst_54 = arith.constant 2.000000e+00 : f32
    %186 = vector.broadcast %cst_54 : f32 to vector<8x16xf32>
    %187 = arith.mulf %186, %165 : vector<8x16xf32>
    %188 = arith.addf %155, %187 : vector<8x16xf32>
    %cst_55 = arith.constant 2.000000e+00 : f32
    %189 = vector.broadcast %cst_55 : f32 to vector<8x16xf32>
    %190 = arith.mulf %189, %175 : vector<8x16xf32>
    %191 = arith.addf %188, %190 : vector<8x16xf32>
    %192 = arith.addf %191, %185 : vector<8x16xf32>
    %193 = vector.broadcast %18 : f32 to vector<8x16xf32>
    %194 = arith.mulf %193, %192 : vector<8x16xf32>
    %195 = arith.addf %148, %194 : vector<8x16xf32>
    %196 = arith.truncf %195 : vector<8x16xf32> to vector<8x16xbf16>
    %cst_56 = arith.constant dense<0.000000e+00> : vector<8x32xf32>
    %197 = tpu.matmul %196, %45, %cst_56 {dimension_numbers = #tpu.dot_dimension_numbers<[1], [0], [0], [1], [0, 0, 1, 1], [], []>} : vector<8x16xbf16>, vector<16x32xbf16>, vector<8x32xf32> -> vector<8x32xf32>
    %198 = arith.addf %197, %50 : vector<8x32xf32>
    %199 = math.tanh %198 : vector<8x32xf32>
    %200 = arith.truncf %199 : vector<8x32xf32> to vector<8x32xbf16>
    %cst_57 = arith.constant dense<0.000000e+00> : vector<8x16xf32>
    %201 = tpu.matmul %200, %47, %cst_57 {dimension_numbers = #tpu.dot_dimension_numbers<[1], [0], [0], [1], [0, 0, 1, 1], [], []>} : vector<8x32xbf16>, vector<32x16xbf16>, vector<8x16xf32> -> vector<8x16xf32>
    %202 = arith.addf %201, %53 : vector<8x16xf32>
    %203 = vector.broadcast %22 : f32 to vector<8x16xf32>
    %204 = arith.mulf %203, %202 : vector<8x16xf32>
    %205 = arith.addf %195, %204 : vector<8x16xf32>
    %206 = arith.truncf %205 : vector<8x16xf32> to vector<8x16xbf16>
    %cst_58 = arith.constant dense<0.000000e+00> : vector<8x32xf32>
    %207 = tpu.matmul %206, %45, %cst_58 {dimension_numbers = #tpu.dot_dimension_numbers<[1], [0], [0], [1], [0, 0, 1, 1], [], []>} : vector<8x16xbf16>, vector<16x32xbf16>, vector<8x32xf32> -> vector<8x32xf32>
    %208 = arith.addf %207, %50 : vector<8x32xf32>
    %209 = math.tanh %208 : vector<8x32xf32>
    %210 = arith.truncf %209 : vector<8x32xf32> to vector<8x32xbf16>
    %cst_59 = arith.constant dense<0.000000e+00> : vector<8x16xf32>
    %211 = tpu.matmul %210, %47, %cst_59 {dimension_numbers = #tpu.dot_dimension_numbers<[1], [0], [0], [1], [0, 0, 1, 1], [], []>} : vector<8x32xbf16>, vector<32x16xbf16>, vector<8x16xf32> -> vector<8x16xf32>
    %212 = arith.addf %211, %53 : vector<8x16xf32>
    %213 = vector.broadcast %22 : f32 to vector<8x16xf32>
    %214 = arith.mulf %213, %212 : vector<8x16xf32>
    %215 = arith.addf %195, %214 : vector<8x16xf32>
    %216 = arith.truncf %215 : vector<8x16xf32> to vector<8x16xbf16>
    %cst_60 = arith.constant dense<0.000000e+00> : vector<8x32xf32>
    %217 = tpu.matmul %216, %45, %cst_60 {dimension_numbers = #tpu.dot_dimension_numbers<[1], [0], [0], [1], [0, 0, 1, 1], [], []>} : vector<8x16xbf16>, vector<16x32xbf16>, vector<8x32xf32> -> vector<8x32xf32>
    %218 = arith.addf %217, %50 : vector<8x32xf32>
    %219 = math.tanh %218 : vector<8x32xf32>
    %220 = arith.truncf %219 : vector<8x32xf32> to vector<8x32xbf16>
    %cst_61 = arith.constant dense<0.000000e+00> : vector<8x16xf32>
    %221 = tpu.matmul %220, %47, %cst_61 {dimension_numbers = #tpu.dot_dimension_numbers<[1], [0], [0], [1], [0, 0, 1, 1], [], []>} : vector<8x32xbf16>, vector<32x16xbf16>, vector<8x16xf32> -> vector<8x16xf32>
    %222 = arith.addf %221, %53 : vector<8x16xf32>
    %223 = vector.broadcast %21 : f32 to vector<8x16xf32>
    %224 = arith.mulf %223, %222 : vector<8x16xf32>
    %225 = arith.addf %195, %224 : vector<8x16xf32>
    %226 = arith.truncf %225 : vector<8x16xf32> to vector<8x16xbf16>
    %cst_62 = arith.constant dense<0.000000e+00> : vector<8x32xf32>
    %227 = tpu.matmul %226, %45, %cst_62 {dimension_numbers = #tpu.dot_dimension_numbers<[1], [0], [0], [1], [0, 0, 1, 1], [], []>} : vector<8x16xbf16>, vector<16x32xbf16>, vector<8x32xf32> -> vector<8x32xf32>
    %228 = arith.addf %227, %50 : vector<8x32xf32>
    %229 = math.tanh %228 : vector<8x32xf32>
    %230 = arith.truncf %229 : vector<8x32xf32> to vector<8x32xbf16>
    %cst_63 = arith.constant dense<0.000000e+00> : vector<8x16xf32>
    %231 = tpu.matmul %230, %47, %cst_63 {dimension_numbers = #tpu.dot_dimension_numbers<[1], [0], [0], [1], [0, 0, 1, 1], [], []>} : vector<8x32xbf16>, vector<32x16xbf16>, vector<8x16xf32> -> vector<8x16xf32>
    %232 = arith.addf %231, %53 : vector<8x16xf32>
    %cst_64 = arith.constant 2.000000e+00 : f32
    %233 = vector.broadcast %cst_64 : f32 to vector<8x16xf32>
    %234 = arith.mulf %233, %212 : vector<8x16xf32>
    %235 = arith.addf %202, %234 : vector<8x16xf32>
    %cst_65 = arith.constant 2.000000e+00 : f32
    %236 = vector.broadcast %cst_65 : f32 to vector<8x16xf32>
    %237 = arith.mulf %236, %222 : vector<8x16xf32>
    %238 = arith.addf %235, %237 : vector<8x16xf32>
    %239 = arith.addf %238, %232 : vector<8x16xf32>
    %240 = vector.broadcast %23 : f32 to vector<8x16xf32>
    %241 = arith.mulf %240, %239 : vector<8x16xf32>
    %242 = arith.addf %195, %241 : vector<8x16xf32>
    %243 = arith.truncf %242 : vector<8x16xf32> to vector<8x16xbf16>
    %cst_66 = arith.constant dense<0.000000e+00> : vector<8x32xf32>
    %244 = tpu.matmul %243, %45, %cst_66 {dimension_numbers = #tpu.dot_dimension_numbers<[1], [0], [0], [1], [0, 0, 1, 1], [], []>} : vector<8x16xbf16>, vector<16x32xbf16>, vector<8x32xf32> -> vector<8x32xf32>
    %245 = arith.addf %244, %50 : vector<8x32xf32>
    %246 = math.tanh %245 : vector<8x32xf32>
    %247 = arith.truncf %246 : vector<8x32xf32> to vector<8x32xbf16>
    %cst_67 = arith.constant dense<0.000000e+00> : vector<8x16xf32>
    %248 = tpu.matmul %247, %47, %cst_67 {dimension_numbers = #tpu.dot_dimension_numbers<[1], [0], [0], [1], [0, 0, 1, 1], [], []>} : vector<8x32xbf16>, vector<32x16xbf16>, vector<8x16xf32> -> vector<8x16xf32>
    %249 = arith.addf %248, %53 : vector<8x16xf32>
    %250 = vector.broadcast %27 : f32 to vector<8x16xf32>
    %251 = arith.mulf %250, %249 : vector<8x16xf32>
    %252 = arith.addf %242, %251 : vector<8x16xf32>
    %253 = arith.truncf %252 : vector<8x16xf32> to vector<8x16xbf16>
    %cst_68 = arith.constant dense<0.000000e+00> : vector<8x32xf32>
    %254 = tpu.matmul %253, %45, %cst_68 {dimension_numbers = #tpu.dot_dimension_numbers<[1], [0], [0], [1], [0, 0, 1, 1], [], []>} : vector<8x16xbf16>, vector<16x32xbf16>, vector<8x32xf32> -> vector<8x32xf32>
    %255 = arith.addf %254, %50 : vector<8x32xf32>
    %256 = math.tanh %255 : vector<8x32xf32>
    %257 = arith.truncf %256 : vector<8x32xf32> to vector<8x32xbf16>
    %cst_69 = arith.constant dense<0.000000e+00> : vector<8x16xf32>
    %258 = tpu.matmul %257, %47, %cst_69 {dimension_numbers = #tpu.dot_dimension_numbers<[1], [0], [0], [1], [0, 0, 1, 1], [], []>} : vector<8x32xbf16>, vector<32x16xbf16>, vector<8x16xf32> -> vector<8x16xf32>
    %259 = arith.addf %258, %53 : vector<8x16xf32>
    %260 = vector.broadcast %27 : f32 to vector<8x16xf32>
    %261 = arith.mulf %260, %259 : vector<8x16xf32>
    %262 = arith.addf %242, %261 : vector<8x16xf32>
    %263 = arith.truncf %262 : vector<8x16xf32> to vector<8x16xbf16>
    %cst_70 = arith.constant dense<0.000000e+00> : vector<8x32xf32>
    %264 = tpu.matmul %263, %45, %cst_70 {dimension_numbers = #tpu.dot_dimension_numbers<[1], [0], [0], [1], [0, 0, 1, 1], [], []>} : vector<8x16xbf16>, vector<16x32xbf16>, vector<8x32xf32> -> vector<8x32xf32>
    %265 = arith.addf %264, %50 : vector<8x32xf32>
    %266 = math.tanh %265 : vector<8x32xf32>
    %267 = arith.truncf %266 : vector<8x32xf32> to vector<8x32xbf16>
    %cst_71 = arith.constant dense<0.000000e+00> : vector<8x16xf32>
    %268 = tpu.matmul %267, %47, %cst_71 {dimension_numbers = #tpu.dot_dimension_numbers<[1], [0], [0], [1], [0, 0, 1, 1], [], []>} : vector<8x32xbf16>, vector<32x16xbf16>, vector<8x16xf32> -> vector<8x16xf32>
    %269 = arith.addf %268, %53 : vector<8x16xf32>
    %270 = vector.broadcast %26 : f32 to vector<8x16xf32>
    %271 = arith.mulf %270, %269 : vector<8x16xf32>
    %272 = arith.addf %242, %271 : vector<8x16xf32>
    %273 = arith.truncf %272 : vector<8x16xf32> to vector<8x16xbf16>
    %cst_72 = arith.constant dense<0.000000e+00> : vector<8x32xf32>
    %274 = tpu.matmul %273, %45, %cst_72 {dimension_numbers = #tpu.dot_dimension_numbers<[1], [0], [0], [1], [0, 0, 1, 1], [], []>} : vector<8x16xbf16>, vector<16x32xbf16>, vector<8x32xf32> -> vector<8x32xf32>
    %275 = arith.addf %274, %50 : vector<8x32xf32>
    %276 = math.tanh %275 : vector<8x32xf32>
    %277 = arith.truncf %276 : vector<8x32xf32> to vector<8x32xbf16>
    %cst_73 = arith.constant dense<0.000000e+00> : vector<8x16xf32>
    %278 = tpu.matmul %277, %47, %cst_73 {dimension_numbers = #tpu.dot_dimension_numbers<[1], [0], [0], [1], [0, 0, 1, 1], [], []>} : vector<8x32xbf16>, vector<32x16xbf16>, vector<8x16xf32> -> vector<8x16xf32>
    %279 = arith.addf %278, %53 : vector<8x16xf32>
    %cst_74 = arith.constant 2.000000e+00 : f32
    %280 = vector.broadcast %cst_74 : f32 to vector<8x16xf32>
    %281 = arith.mulf %280, %259 : vector<8x16xf32>
    %282 = arith.addf %249, %281 : vector<8x16xf32>
    %cst_75 = arith.constant 2.000000e+00 : f32
    %283 = vector.broadcast %cst_75 : f32 to vector<8x16xf32>
    %284 = arith.mulf %283, %269 : vector<8x16xf32>
    %285 = arith.addf %282, %284 : vector<8x16xf32>
    %286 = arith.addf %285, %279 : vector<8x16xf32>
    %287 = vector.broadcast %28 : f32 to vector<8x16xf32>
    %288 = arith.mulf %287, %286 : vector<8x16xf32>
    %289 = arith.addf %242, %288 : vector<8x16xf32>
    %290 = arith.truncf %289 : vector<8x16xf32> to vector<8x16xbf16>
    %cst_76 = arith.constant dense<0.000000e+00> : vector<8x32xf32>
    %291 = tpu.matmul %290, %45, %cst_76 {dimension_numbers = #tpu.dot_dimension_numbers<[1], [0], [0], [1], [0, 0, 1, 1], [], []>} : vector<8x16xbf16>, vector<16x32xbf16>, vector<8x32xf32> -> vector<8x32xf32>
    %292 = arith.addf %291, %50 : vector<8x32xf32>
    %293 = math.tanh %292 : vector<8x32xf32>
    %294 = arith.truncf %293 : vector<8x32xf32> to vector<8x32xbf16>
    %cst_77 = arith.constant dense<0.000000e+00> : vector<8x16xf32>
    %295 = tpu.matmul %294, %47, %cst_77 {dimension_numbers = #tpu.dot_dimension_numbers<[1], [0], [0], [1], [0, 0, 1, 1], [], []>} : vector<8x32xbf16>, vector<32x16xbf16>, vector<8x16xf32> -> vector<8x16xf32>
    %296 = arith.addf %295, %53 : vector<8x16xf32>
    %297 = vector.broadcast %32 : f32 to vector<8x16xf32>
    %298 = arith.mulf %297, %296 : vector<8x16xf32>
    %299 = arith.addf %289, %298 : vector<8x16xf32>
    %300 = arith.truncf %299 : vector<8x16xf32> to vector<8x16xbf16>
    %cst_78 = arith.constant dense<0.000000e+00> : vector<8x32xf32>
    %301 = tpu.matmul %300, %45, %cst_78 {dimension_numbers = #tpu.dot_dimension_numbers<[1], [0], [0], [1], [0, 0, 1, 1], [], []>} : vector<8x16xbf16>, vector<16x32xbf16>, vector<8x32xf32> -> vector<8x32xf32>
    %302 = arith.addf %301, %50 : vector<8x32xf32>
    %303 = math.tanh %302 : vector<8x32xf32>
    %304 = arith.truncf %303 : vector<8x32xf32> to vector<8x32xbf16>
    %cst_79 = arith.constant dense<0.000000e+00> : vector<8x16xf32>
    %305 = tpu.matmul %304, %47, %cst_79 {dimension_numbers = #tpu.dot_dimension_numbers<[1], [0], [0], [1], [0, 0, 1, 1], [], []>} : vector<8x32xbf16>, vector<32x16xbf16>, vector<8x16xf32> -> vector<8x16xf32>
    %306 = arith.addf %305, %53 : vector<8x16xf32>
    %307 = vector.broadcast %32 : f32 to vector<8x16xf32>
    %308 = arith.mulf %307, %306 : vector<8x16xf32>
    %309 = arith.addf %289, %308 : vector<8x16xf32>
    %310 = arith.truncf %309 : vector<8x16xf32> to vector<8x16xbf16>
    %cst_80 = arith.constant dense<0.000000e+00> : vector<8x32xf32>
    %311 = tpu.matmul %310, %45, %cst_80 {dimension_numbers = #tpu.dot_dimension_numbers<[1], [0], [0], [1], [0, 0, 1, 1], [], []>} : vector<8x16xbf16>, vector<16x32xbf16>, vector<8x32xf32> -> vector<8x32xf32>
    %312 = arith.addf %311, %50 : vector<8x32xf32>
    %313 = math.tanh %312 : vector<8x32xf32>
    %314 = arith.truncf %313 : vector<8x32xf32> to vector<8x32xbf16>
    %cst_81 = arith.constant dense<0.000000e+00> : vector<8x16xf32>
    %315 = tpu.matmul %314, %47, %cst_81 {dimension_numbers = #tpu.dot_dimension_numbers<[1], [0], [0], [1], [0, 0, 1, 1], [], []>} : vector<8x32xbf16>, vector<32x16xbf16>, vector<8x16xf32> -> vector<8x16xf32>
    %316 = arith.addf %315, %53 : vector<8x16xf32>
    %317 = vector.broadcast %31 : f32 to vector<8x16xf32>
    %318 = arith.mulf %317, %316 : vector<8x16xf32>
    %319 = arith.addf %289, %318 : vector<8x16xf32>
    %320 = arith.truncf %319 : vector<8x16xf32> to vector<8x16xbf16>
    %cst_82 = arith.constant dense<0.000000e+00> : vector<8x32xf32>
    %321 = tpu.matmul %320, %45, %cst_82 {dimension_numbers = #tpu.dot_dimension_numbers<[1], [0], [0], [1], [0, 0, 1, 1], [], []>} : vector<8x16xbf16>, vector<16x32xbf16>, vector<8x32xf32> -> vector<8x32xf32>
    %322 = arith.addf %321, %50 : vector<8x32xf32>
    %323 = math.tanh %322 : vector<8x32xf32>
    %324 = arith.truncf %323 : vector<8x32xf32> to vector<8x32xbf16>
    %cst_83 = arith.constant dense<0.000000e+00> : vector<8x16xf32>
    %325 = tpu.matmul %324, %47, %cst_83 {dimension_numbers = #tpu.dot_dimension_numbers<[1], [0], [0], [1], [0, 0, 1, 1], [], []>} : vector<8x32xbf16>, vector<32x16xbf16>, vector<8x16xf32> -> vector<8x16xf32>
    %326 = arith.addf %325, %53 : vector<8x16xf32>
    %cst_84 = arith.constant 2.000000e+00 : f32
    %327 = vector.broadcast %cst_84 : f32 to vector<8x16xf32>
    %328 = arith.mulf %327, %306 : vector<8x16xf32>
    %329 = arith.addf %296, %328 : vector<8x16xf32>
    %cst_85 = arith.constant 2.000000e+00 : f32
    %330 = vector.broadcast %cst_85 : f32 to vector<8x16xf32>
    %331 = arith.mulf %330, %316 : vector<8x16xf32>
    %332 = arith.addf %329, %331 : vector<8x16xf32>
    %333 = arith.addf %332, %326 : vector<8x16xf32>
    %334 = vector.broadcast %33 : f32 to vector<8x16xf32>
    %335 = arith.mulf %334, %333 : vector<8x16xf32>
    %336 = arith.addf %289, %335 : vector<8x16xf32>
    %337 = arith.truncf %336 : vector<8x16xf32> to vector<8x16xbf16>
    %cst_86 = arith.constant dense<0.000000e+00> : vector<8x32xf32>
    %338 = tpu.matmul %337, %45, %cst_86 {dimension_numbers = #tpu.dot_dimension_numbers<[1], [0], [0], [1], [0, 0, 1, 1], [], []>} : vector<8x16xbf16>, vector<16x32xbf16>, vector<8x32xf32> -> vector<8x32xf32>
    %339 = arith.addf %338, %50 : vector<8x32xf32>
    %340 = math.tanh %339 : vector<8x32xf32>
    %341 = arith.truncf %340 : vector<8x32xf32> to vector<8x32xbf16>
    %cst_87 = arith.constant dense<0.000000e+00> : vector<8x16xf32>
    %342 = tpu.matmul %341, %47, %cst_87 {dimension_numbers = #tpu.dot_dimension_numbers<[1], [0], [0], [1], [0, 0, 1, 1], [], []>} : vector<8x32xbf16>, vector<32x16xbf16>, vector<8x16xf32> -> vector<8x16xf32>
    %343 = arith.addf %342, %53 : vector<8x16xf32>
    %344 = vector.broadcast %37 : f32 to vector<8x16xf32>
    %345 = arith.mulf %344, %343 : vector<8x16xf32>
    %346 = arith.addf %336, %345 : vector<8x16xf32>
    %347 = arith.truncf %346 : vector<8x16xf32> to vector<8x16xbf16>
    %cst_88 = arith.constant dense<0.000000e+00> : vector<8x32xf32>
    %348 = tpu.matmul %347, %45, %cst_88 {dimension_numbers = #tpu.dot_dimension_numbers<[1], [0], [0], [1], [0, 0, 1, 1], [], []>} : vector<8x16xbf16>, vector<16x32xbf16>, vector<8x32xf32> -> vector<8x32xf32>
    %349 = arith.addf %348, %50 : vector<8x32xf32>
    %350 = math.tanh %349 : vector<8x32xf32>
    %351 = arith.truncf %350 : vector<8x32xf32> to vector<8x32xbf16>
    %cst_89 = arith.constant dense<0.000000e+00> : vector<8x16xf32>
    %352 = tpu.matmul %351, %47, %cst_89 {dimension_numbers = #tpu.dot_dimension_numbers<[1], [0], [0], [1], [0, 0, 1, 1], [], []>} : vector<8x32xbf16>, vector<32x16xbf16>, vector<8x16xf32> -> vector<8x16xf32>
    %353 = arith.addf %352, %53 : vector<8x16xf32>
    %354 = vector.broadcast %37 : f32 to vector<8x16xf32>
    %355 = arith.mulf %354, %353 : vector<8x16xf32>
    %356 = arith.addf %336, %355 : vector<8x16xf32>
    %357 = arith.truncf %356 : vector<8x16xf32> to vector<8x16xbf16>
    %cst_90 = arith.constant dense<0.000000e+00> : vector<8x32xf32>
    %358 = tpu.matmul %357, %45, %cst_90 {dimension_numbers = #tpu.dot_dimension_numbers<[1], [0], [0], [1], [0, 0, 1, 1], [], []>} : vector<8x16xbf16>, vector<16x32xbf16>, vector<8x32xf32> -> vector<8x32xf32>
    %359 = arith.addf %358, %50 : vector<8x32xf32>
    %360 = math.tanh %359 : vector<8x32xf32>
    %361 = arith.truncf %360 : vector<8x32xf32> to vector<8x32xbf16>
    %cst_91 = arith.constant dense<0.000000e+00> : vector<8x16xf32>
    %362 = tpu.matmul %361, %47, %cst_91 {dimension_numbers = #tpu.dot_dimension_numbers<[1], [0], [0], [1], [0, 0, 1, 1], [], []>} : vector<8x32xbf16>, vector<32x16xbf16>, vector<8x16xf32> -> vector<8x16xf32>
    %363 = arith.addf %362, %53 : vector<8x16xf32>
    %364 = vector.broadcast %36 : f32 to vector<8x16xf32>
    %365 = arith.mulf %364, %363 : vector<8x16xf32>
    %366 = arith.addf %336, %365 : vector<8x16xf32>
    %367 = arith.truncf %366 : vector<8x16xf32> to vector<8x16xbf16>
    %cst_92 = arith.constant dense<0.000000e+00> : vector<8x32xf32>
    %368 = tpu.matmul %367, %45, %cst_92 {dimension_numbers = #tpu.dot_dimension_numbers<[1], [0], [0], [1], [0, 0, 1, 1], [], []>} : vector<8x16xbf16>, vector<16x32xbf16>, vector<8x32xf32> -> vector<8x32xf32>
    %369 = arith.addf %368, %50 : vector<8x32xf32>
    %370 = math.tanh %369 : vector<8x32xf32>
    %371 = arith.truncf %370 : vector<8x32xf32> to vector<8x32xbf16>
    %cst_93 = arith.constant dense<0.000000e+00> : vector<8x16xf32>
    %372 = tpu.matmul %371, %47, %cst_93 {dimension_numbers = #tpu.dot_dimension_numbers<[1], [0], [0], [1], [0, 0, 1, 1], [], []>} : vector<8x32xbf16>, vector<32x16xbf16>, vector<8x16xf32> -> vector<8x16xf32>
    %373 = arith.addf %372, %53 : vector<8x16xf32>
    %cst_94 = arith.constant 2.000000e+00 : f32
    %374 = vector.broadcast %cst_94 : f32 to vector<8x16xf32>
    %375 = arith.mulf %374, %353 : vector<8x16xf32>
    %376 = arith.addf %343, %375 : vector<8x16xf32>
    %cst_95 = arith.constant 2.000000e+00 : f32
    %377 = vector.broadcast %cst_95 : f32 to vector<8x16xf32>
    %378 = arith.mulf %377, %363 : vector<8x16xf32>
    %379 = arith.addf %376, %378 : vector<8x16xf32>
    %380 = arith.addf %379, %373 : vector<8x16xf32>
    %381 = vector.broadcast %38 : f32 to vector<8x16xf32>
    %382 = arith.mulf %381, %380 : vector<8x16xf32>
    %383 = arith.addf %336, %382 : vector<8x16xf32>
    %384 = arith.truncf %383 : vector<8x16xf32> to vector<8x16xbf16>
    %cst_96 = arith.constant dense<0.000000e+00> : vector<8x32xf32>
    %385 = tpu.matmul %384, %45, %cst_96 {dimension_numbers = #tpu.dot_dimension_numbers<[1], [0], [0], [1], [0, 0, 1, 1], [], []>} : vector<8x16xbf16>, vector<16x32xbf16>, vector<8x32xf32> -> vector<8x32xf32>
    %386 = arith.addf %385, %50 : vector<8x32xf32>
    %387 = math.tanh %386 : vector<8x32xf32>
    %388 = arith.truncf %387 : vector<8x32xf32> to vector<8x32xbf16>
    %cst_97 = arith.constant dense<0.000000e+00> : vector<8x16xf32>
    %389 = tpu.matmul %388, %47, %cst_97 {dimension_numbers = #tpu.dot_dimension_numbers<[1], [0], [0], [1], [0, 0, 1, 1], [], []>} : vector<8x32xbf16>, vector<32x16xbf16>, vector<8x16xf32> -> vector<8x16xf32>
    %390 = arith.addf %389, %53 : vector<8x16xf32>
    %391 = vector.broadcast %42 : f32 to vector<8x16xf32>
    %392 = arith.mulf %391, %390 : vector<8x16xf32>
    %393 = arith.addf %383, %392 : vector<8x16xf32>
    %394 = arith.truncf %393 : vector<8x16xf32> to vector<8x16xbf16>
    %cst_98 = arith.constant dense<0.000000e+00> : vector<8x32xf32>
    %395 = tpu.matmul %394, %45, %cst_98 {dimension_numbers = #tpu.dot_dimension_numbers<[1], [0], [0], [1], [0, 0, 1, 1], [], []>} : vector<8x16xbf16>, vector<16x32xbf16>, vector<8x32xf32> -> vector<8x32xf32>
    %396 = arith.addf %395, %50 : vector<8x32xf32>
    %397 = math.tanh %396 : vector<8x32xf32>
    %398 = arith.truncf %397 : vector<8x32xf32> to vector<8x32xbf16>
    %cst_99 = arith.constant dense<0.000000e+00> : vector<8x16xf32>
    %399 = tpu.matmul %398, %47, %cst_99 {dimension_numbers = #tpu.dot_dimension_numbers<[1], [0], [0], [1], [0, 0, 1, 1], [], []>} : vector<8x32xbf16>, vector<32x16xbf16>, vector<8x16xf32> -> vector<8x16xf32>
    %400 = arith.addf %399, %53 : vector<8x16xf32>
    %401 = vector.broadcast %42 : f32 to vector<8x16xf32>
    %402 = arith.mulf %401, %400 : vector<8x16xf32>
    %403 = arith.addf %383, %402 : vector<8x16xf32>
    %404 = arith.truncf %403 : vector<8x16xf32> to vector<8x16xbf16>
    %cst_100 = arith.constant dense<0.000000e+00> : vector<8x32xf32>
    %405 = tpu.matmul %404, %45, %cst_100 {dimension_numbers = #tpu.dot_dimension_numbers<[1], [0], [0], [1], [0, 0, 1, 1], [], []>} : vector<8x16xbf16>, vector<16x32xbf16>, vector<8x32xf32> -> vector<8x32xf32>
    %406 = arith.addf %405, %50 : vector<8x32xf32>
    %407 = math.tanh %406 : vector<8x32xf32>
    %408 = arith.truncf %407 : vector<8x32xf32> to vector<8x32xbf16>
    %cst_101 = arith.constant dense<0.000000e+00> : vector<8x16xf32>
    %409 = tpu.matmul %408, %47, %cst_101 {dimension_numbers = #tpu.dot_dimension_numbers<[1], [0], [0], [1], [0, 0, 1, 1], [], []>} : vector<8x32xbf16>, vector<32x16xbf16>, vector<8x16xf32> -> vector<8x16xf32>
    %410 = arith.addf %409, %53 : vector<8x16xf32>
    %411 = vector.broadcast %41 : f32 to vector<8x16xf32>
    %412 = arith.mulf %411, %410 : vector<8x16xf32>
    %413 = arith.addf %383, %412 : vector<8x16xf32>
    %414 = arith.truncf %413 : vector<8x16xf32> to vector<8x16xbf16>
    %cst_102 = arith.constant dense<0.000000e+00> : vector<8x32xf32>
    %415 = tpu.matmul %414, %45, %cst_102 {dimension_numbers = #tpu.dot_dimension_numbers<[1], [0], [0], [1], [0, 0, 1, 1], [], []>} : vector<8x16xbf16>, vector<16x32xbf16>, vector<8x32xf32> -> vector<8x32xf32>
    %416 = arith.addf %415, %50 : vector<8x32xf32>
    %417 = math.tanh %416 : vector<8x32xf32>
    %418 = arith.truncf %417 : vector<8x32xf32> to vector<8x32xbf16>
    %cst_103 = arith.constant dense<0.000000e+00> : vector<8x16xf32>
    %419 = tpu.matmul %418, %47, %cst_103 {dimension_numbers = #tpu.dot_dimension_numbers<[1], [0], [0], [1], [0, 0, 1, 1], [], []>} : vector<8x32xbf16>, vector<32x16xbf16>, vector<8x16xf32> -> vector<8x16xf32>
    %420 = arith.addf %419, %53 : vector<8x16xf32>
    %cst_104 = arith.constant 2.000000e+00 : f32
    %421 = vector.broadcast %cst_104 : f32 to vector<8x16xf32>
    %422 = arith.mulf %421, %400 : vector<8x16xf32>
    %423 = arith.addf %390, %422 : vector<8x16xf32>
    %cst_105 = arith.constant 2.000000e+00 : f32
    %424 = vector.broadcast %cst_105 : f32 to vector<8x16xf32>
    %425 = arith.mulf %424, %410 : vector<8x16xf32>
    %426 = arith.addf %423, %425 : vector<8x16xf32>
    %427 = arith.addf %426, %420 : vector<8x16xf32>
    %428 = vector.broadcast %43 : f32 to vector<8x16xf32>
    %429 = arith.mulf %428, %427 : vector<8x16xf32>
    %430 = arith.addf %383, %429 : vector<8x16xf32>
    %431 = tpu.concatenate %101, %148, %195, %242, %289, %336, %383, %430 in 1 : vector<8x16xf32>, vector<8x16xf32>, vector<8x16xf32>, vector<8x16xf32>, vector<8x16xf32>, vector<8x16xf32>, vector<8x16xf32>, vector<8x16xf32> -> vector<8x128xf32>
    %c0_106 = arith.constant 0 : index
    %c0_107 = arith.constant 0 : index
    %432 = vector.load %arg8[%c0_106, %c0_107] : memref<8x128xf32, #tpu.memory_space<vmem>>, vector<8x128xf32>
    tpu.vector_store %arg8[%c0_106, %c0_107], %431 {strides = array<i32>} : memref<8x128xf32, #tpu.memory_space<vmem>>, vector<8x128xf32>,
    %c0_108 = arith.constant 0 : index
    %c0_109 = arith.constant 0 : index
    %433 = vector.load %arg9[%c0_108, %c0_109] : memref<8x16xf32, #tpu.memory_space<vmem>>, vector<8x16xf32>
    tpu.vector_store %arg9[%c0_108, %c0_109], %430 {strides = array<i32>} : memref<8x16xf32, #tpu.memory_space<vmem>>, vector<8x16xf32>,
    return
  }
  func.func @transform_0(%arg0: i32, %arg1: i32, %arg2: memref<8xf32, #tpu.memory_space<smem>>) -> (i32, i32) {
    %c0_i32 = arith.constant 0 : i32
    %c0_i32_0 = arith.constant 0 : i32
    return %arg0, %c0_i32 : i32, i32
  }
  func.func @transform_1(%arg0: i32, %arg1: i32, %arg2: memref<8xf32, #tpu.memory_space<smem>>) -> (i32, i32) {
    %c0_i32 = arith.constant 0 : i32
    %c0_i32_0 = arith.constant 0 : i32
    %c0_i32_1 = arith.constant 0 : i32
    return %c0_i32, %c0_i32_0 : i32, i32
  }
  func.func @transform_2(%arg0: i32, %arg1: i32, %arg2: memref<8xf32, #tpu.memory_space<smem>>) -> (i32, i32) {
    %c0_i32 = arith.constant 0 : i32
    %c0_i32_0 = arith.constant 0 : i32
    %c0_i32_1 = arith.constant 0 : i32
    return %c0_i32, %c0_i32_0 : i32, i32
  }
  func.func @transform_3(%arg0: i32, %arg1: i32, %arg2: memref<8xf32, #tpu.memory_space<smem>>) -> (i32, i32) {
    %c0_i32 = arith.constant 0 : i32
    %c0_i32_0 = arith.constant 0 : i32
    %c0_i32_1 = arith.constant 0 : i32
    return %c0_i32, %c0_i32_0 : i32, i32
  }
  func.func @transform_4(%arg0: i32, %arg1: i32, %arg2: memref<8xf32, #tpu.memory_space<smem>>) -> (i32, i32) {
    %c0_i32 = arith.constant 0 : i32
    %c0_i32_0 = arith.constant 0 : i32
    %c0_i32_1 = arith.constant 0 : i32
    return %c0_i32, %c0_i32_0 : i32, i32
  }
  func.func @transform_5(%arg0: i32, %arg1: i32, %arg2: memref<8xf32, #tpu.memory_space<smem>>) -> (i32, i32) {
    %c0_i32 = arith.constant 0 : i32
    return %arg0, %arg1 : i32, i32
  }
}

</mosaic_0001>

<bundles_post_ra>
// kernel: diffeq_solver_augmented_forward.1
= control target key start
LH: loop header
LB: loop body
LE: loop exit
PB: predicated region body
PF: predicated region fallthrough
CT: control target
= control target key end

     0   :  { %s4547_s0 = inlined_call_operand.vmem [shape: f32[8], index: 0, kind: input, shape index: {}]   ;;  %s4548_s1 = inlined_call_operand.vmem [shape: f32[8,16], index: 1, kind: input, shape index: {}]   ;;  %s4549_s2 = inlined_call_operand.vmem [shape: f32[16,32], index: 2, kind: input, shape index: {}]   ;;  %s4550_s3 = inlined_call_operand.vmem [shape: f32[1,32], index: 3, kind: input, shape index: {}]   ;;  %s4551_s4 = inlined_call_operand.vmem [shape: f32[32,16], index: 4, kind: input, shape index: {}]   ;;  %s4552_s5 = inlined_call_operand.vmem [shape: f32[1,16], index: 5, kind: input, shape index: {}]   ;;  %s4553_s6 = inlined_call_operand.vmem [shape: f32[8,128], index: 6, kind: output, shape index: {}]  }
   0x1   :  { %s11_s23 = sshll.u32 %s4547_s0, 4  ;;  %s12_s23 = int_to_ptr.vmem [resolvable:$true] %s11_s23 }
   0x2   :  { %s3872_s24 = scalar_lea.vmem %s12_s23, 16  ;;  %p3877_p1 = scmp.lt.s32.totalorder %s12_s23, %s12_s23 }
   0x3   :  { %p3873_p0 = scmp.ne.s32.totalorder %s12_s23, %s3872_s24  ;;  %p3878_p2 = scmp.lt.s32.totalorder %s3872_s24, %s3872_s24 }
   0x5   :  { %p3879_p3 = por %p3878_p2, %p3877_p1 }
   0x7   :  { %p3880_p4 = pnand %p3879_p3, %p3873_p0 }
   0x9   :  { %3883 = shalt.err (!%p3880_p4)  }
   0xa   :  { %s3886_s25 = smov [#allocation4]  }
   0xb   :  { %14 = dma.vmem_to_smem %s12_s23, 16, %s3886_s25, [#allocation3] }
   0xc   :  { %3884 = dma.done.wait [#allocation3], 16 }
   0xd   :  { %3885 = vsyncadd [#allocation3], 4294967280 }
   0xe   :  { %16 = sfence }
   0xf   :  { %v67_v0 = vld [vmem:[%s4549_s2] sm:$0xff]  ;;  %v68_v1 = vld [vmem:[%s4549_s2 + $0x8] sm:$0xff]  ;;  %vm33_vm0 = vcmask 130048   ;;  %v3887_v3 = vmov 0.0   ;;  %vm3888_vm1 = vmmov 0   ;;  %v72_v10 = vld [vmem:[%s4551_s4 + $0x10] sm:$0xff] }
  0x10   :  { %v32_v2 = vld [vmem:[%s4548_s1] sm:$0xff]  ;;  %3348 = vmatprep.subr.bf16.mxu0 %v3887_v3  ;;  %v3944_v4 = vpack.c.bf16 %v68_v1, %v67_v0  ;;  %3350 = vmatprep.mubr.msk.bf16.mxu0 %vm3888_vm1, %v3887_v3  ;;  %v71_v8 = vld [vmem:[%s4551_s4 + $0x8] sm:$0xff]  ;;  %v73_v11 = vld [vmem:[%s4551_s4 + $0x18] sm:$0xff]  ;;  %vm138_vm2 = vcmask 261120   ;;  %s4070_s19 = sld [smem:[#allocation4 + $0x1]]  ;;  %s3889_s22 = smov 16  }
  0x11   :  { %34 = vst.msk [vmem:[#allocation2] sm:$0xff] %vm33_vm0, %v32_v2  ;;  %3354 = vmatprep.subr.bf16.mxu1 %v3887_v3  ;;  %3358 = vmatprep.mubr.msk.bf16.mxu1 %vm3888_vm1, %v3887_v3  ;;  %v70_v7 = vld [vmem:[%s4551_s4] sm:$0xff]  ;;  %v3979_v12 = vpack.c.bf16 %v73_v11, %v72_v10  ;;  %s3996_s4 = sld [smem:[#allocation4]]  ;;  %s4140_s23 = sld [smem:[#allocation4 + $0x2]]  ;;  %vm3099_vm3 = vcmask 392192   ;;  %vm3101_vm4 = vcmask 523264  }
  0x12   :  { %3349 = vmatpush3.bf16.msra.mxu0 %v3944_v4  ;;  %v3969_v9 = vpack.c.bf16 %v71_v8, %v70_v7  ;;  %v3986_v13 = vld [vmem:[%s4550_s3] ss:$0 sm:$0xff]  ;;  %s3890_s26 = smov 32   ;;  %s4210_s27 = sld [smem:[#allocation4 + $0x3]]  ;;  %vm3103_vm5 = vcmask 654336   ;;  %vm3105_vm6 = vcmask 785408  }
  0x13   :  { %3362 = vmatprep.subr.bf16.mxu0 %v3887_v3  ;;  %v4002_v21 = vld [vmem:[%s4552_s5] ss:$0 sm:$0xff]  ;;  %s3891_s0 = smov 48   ;;  %s4280_s30 = sld [smem:[#allocation4 + $0x4]]  ;;  %vm3107_vm7 = vcmask 916480  }
  0x14   :  { %3355 = vmatpush3.bf16.msra.mxu1 %v3969_v9  ;;  %s3892_s9 = smov 64   ;;  %s4360_s10 = sld [smem:[#allocation4 + $0x5]] }
  0x15   :  { %3356 = vmatprep.subr.bf16.mxu1 %v3887_v3  ;;  %s3893_s13 = smov 80   ;;  %s4430_s14 = sld [smem:[#allocation4 + $0x6]] }
  0x16   :  { %s41_s20 = smul.f32 0.5, %s4070_s19  ;;  %s3894_s16 = smov 96  }
  0x17   :  { %s37_s15 = smul.f32 0.5, %s3996_s4  ;;  %v365_v55 = vstv %s3996_s4  ;;  %s4500_s17 = sld [smem:[#allocation4 + $0x7]] }
  0x18   :  { %v3954_v5 = vld [vmem:[#allocation2] sm:$0xff]  ;;  %3357 = vmatpush3.bf16.msra.mxu1 %v3979_v12  ;;  %s38_s18 = smul.f32 0.16666667, %s3996_s4 }
  0x19   :  { %v91_v6 = vpack.c.bf16 %v3954_v5, %v3954_v5  ;;  %3368 = vmatprep.subr.bf16.mxu1 %v3887_v3  ;;  %v182_v23 = vstv %s37_s15  ;;  %s42_s21 = smul.f32 0.16666667, %s4070_s19 }
  0x1a   :  { %s45_s24 = smul.f32 0.5, %s4140_s23 }
  0x1b   :  { %3351 = vmatmul.mubr.msk.bf16.vlgmr.msra.gmra.mrb[0].mxu0 %vm33_vm0, %v91_v6  ;;  %s46_s25 = smul.f32 0.16666667, %s4140_s23 }
  0x1c   :  { %3363 = vmatpush3.bf16.msra.mxu0 %v3944_v4  ;;  %3364 = vmatprep.mubr.msk.bf16.mxu0 %vm3888_vm1, %v3887_v3  ;;  %s49_s28 = smul.f32 0.5, %s4210_s27 }
  0x1d   :  { %3376 = vmatprep.subr.bf16.mxu0 %v3887_v3  ;;  %s50_s29 = smul.f32 0.16666667, %s4210_s27 }
  0x1e   :  { %s53_s1 = smul.f32 0.5, %s4280_s30 }
  0x1f   :  { %s57_s11 = smul.f32 0.5, %s4360_s10 }
  0x20   :  { %s58_s12 = smul.f32 0.16666667, %s4360_s10 }
  0x21   :  { %s61_s4 = smul.f32 0.5, %s4430_s14 }
  0x22   :  { %s62_s15 = smul.f32 0.16666667, %s4430_s14 }
  0xee   :  { %v130_v14 = vpop.f32.mrb[0].mxu0 }
  0xef   :  { %v131_v15 = vadd.f32 %v3986_v13, %v130_v14  ;;  %v3352_v16 = vpop.f32.mrb[1].mxu0 }
  0xf0   :  { %v133_v17 = vpop.f32.mrb[2].mxu0 }
  0xf1   :  { %3806 = vtanh.f32 %v131_v15  ;;  %v3353_v18 = vpop.f32.mrb[3].mxu0 }
  0xf2   :  { %v462_v18 = vstv %s38_s18  ;;  %s65_s18 = smul.f32 0.5, %s4500_s17 }
  0xfb   :  { %v3807_v19 = vpop.eup %3806 }
  0xfc   :  { %v137_v20 = vpack.c.bf16 %v3807_v19, %v3807_v19 }
  0xfe   :  { %3359 = vmatmul.mubr.msk.bf16.vlgmr.msra.gmra.mrb[0].mxu1 %vm138_vm2, %v137_v20 }
  0xff   :  { %3369 = vmatpush3.bf16.msra.mxu1 %v3969_v9  ;;  %3372 = vmatprep.mubr.msk.bf16.mxu1 %vm3888_vm1, %v3887_v3 }
 0x100   :  { %3370 = vmatprep.subr.bf16.mxu1 %v3887_v3 }
 0x103   :  { %3371 = vmatpush3.bf16.msra.mxu1 %v3979_v12 }
 0x104   :  { %3382 = vmatprep.subr.bf16.mxu1 %v3887_v3 }
 0x1d1   :  { %v176_v22 = vpop.f32.mrb[0].mxu1 }
 0x1d2   :  { %v177_v24 = vadd.f32 %v4002_v21, %v176_v22  ;;  %v3360_v25 = vpop.f32.mrb[1].mxu1 }
 0x1d3   :  { %v179_v26 = vpop.f32.mrb[2].mxu1 }
 0x1d4   :  { %v183_v27 = vmul.f32 %v182_v23, %v177_v24  ;;  %v3361_v28 = vpop.f32.mrb[3].mxu1 }
 0x1d6   :  { %v184_v29 = vadd.f32 %v183_v27, %v3954_v5 }
 0x1d8   :  { %v185_v30 = vpack.c.bf16 %v184_v29, %v184_v29 }
 0x1da   :  { %3365 = vmatmul.mubr.msk.bf16.vlgmr.msra.gmra.mrb[4].mxu0 %vm33_vm0, %v185_v30 }
 0x1db   :  { %3377 = vmatpush3.bf16.msra.mxu0 %v3944_v4  ;;  %3378 = vmatprep.mubr.msk.bf16.mxu0 %vm3888_vm1, %v3887_v3 }
 0x1dc   :  { %3390 = vmatprep.subr.bf16.mxu0 %v3887_v3 }
 0x2ad   :  { %v223_v31 = vpop.f32.mrb[4].mxu0 }
 0x2ae   :  { %v224_v32 = vadd.f32 %v3986_v13, %v223_v31  ;;  %v3366_v33 = vpop.f32.mrb[5].mxu0 }
 0x2af   :  { %v226_v34 = vpop.f32.mrb[6].mxu0  ;;  %v554_v33 = vstv %s41_s20  ;;  %s3895_s20 = smov 112  }
 0x2b0   :  { %3808 = vtanh.f32 %v224_v32  ;;  %v3367_v35 = vpop.f32.mrb[7].mxu0 }
 0x2ba   :  { %v3809_v36 = vpop.eup %3808 }
 0x2bb   :  { %v230_v37 = vpack.c.bf16 %v3809_v36, %v3809_v36 }
 0x2bd   :  { %3373 = vmatmul.mubr.msk.bf16.vlgmr.msra.gmra.mrb[4].mxu1 %vm138_vm2, %v230_v37 }
 0x2be   :  { %3383 = vmatpush3.bf16.msra.mxu1 %v3969_v9  ;;  %3386 = vmatprep.mubr.msk.bf16.mxu1 %vm3888_vm1, %v3887_v3 }
 0x2bf   :  { %3384 = vmatprep.subr.bf16.mxu1 %v3887_v3 }
 0x2c2   :  { %3385 = vmatpush3.bf16.msra.mxu1 %v3979_v12 }
 0x2c3   :  { %3396 = vmatprep.subr.bf16.mxu1 %v3887_v3 }
 0x390   :  { %v268_v38 = vpop.f32.mrb[4].mxu1 }
 0x391   :  { %v269_v39 = vadd.f32 %v4002_v21, %v268_v38  ;;  %v3374_v40 = vpop.f32.mrb[5].mxu1 }
 0x392   :  { %v271_v41 = vpop.f32.mrb[6].mxu1 }
 0x393   :  { %v274_v42 = vmul.f32 %v269_v39, %v182_v23  ;;  %v3375_v43 = vpop.f32.mrb[7].mxu1  ;;  %v457_v53 = vmul.f32 2.0, %v269_v39 }
 0x395   :  { %v275_v44 = vadd.f32 %v274_v42, %v3954_v5  ;;  %v458_v59 = vadd.f32 %v457_v53, %v177_v24 }
 0x397   :  { %v276_v45 = vpack.c.bf16 %v275_v44, %v275_v44 }
 0x399   :  { %3379 = vmatmul.mubr.msk.bf16.vlgmr.msra.gmra.mrb[8].mxu0 %vm33_vm0, %v276_v45 }
 0x39a   :  { %3391 = vmatpush3.bf16.msra.mxu0 %v3944_v4  ;;  %3392 = vmatprep.mubr.msk.bf16.mxu0 %vm3888_vm1, %v3887_v3 }
 0x39b   :  { %3404 = vmatprep.subr.bf16.mxu0 %v3887_v3 }
 0x46c   :  { %v314_v46 = vpop.f32.mrb[8].mxu0 }
 0x46d   :  { %v315_v47 = vadd.f32 %v3986_v13, %v314_v46  ;;  %v3380_v48 = vpop.f32.mrb[9].mxu0 }
 0x46e   :  { %v317_v49 = vpop.f32.mrb[10].mxu0 }
 0x46f   :  { %3810 = vtanh.f32 %v315_v47  ;;  %v3381_v50 = vpop.f32.mrb[11].mxu0 }
 0x479   :  { %v3811_v51 = vpop.eup %3810 }
 0x47a   :  { %v321_v52 = vpack.c.bf16 %v3811_v51, %v3811_v51 }
 0x47c   :  { %3387 = vmatmul.mubr.msk.bf16.vlgmr.msra.gmra.mrb[8].mxu1 %vm138_vm2, %v321_v52 }
 0x47d   :  { %3397 = vmatpush3.bf16.msra.mxu1 %v3969_v9  ;;  %3400 = vmatprep.mubr.msk.bf16.mxu1 %vm3888_vm1, %v3887_v3 }
 0x47e   :  { %3398 = vmatprep.subr.bf16.mxu1 %v3887_v3 }
 0x481   :  { %3399 = vmatpush3.bf16.msra.mxu1 %v3979_v12 }
 0x482   :  { %3410 = vmatprep.subr.bf16.mxu1 %v3887_v3 }
 0x54f   :  { %v359_v54 = vpop.f32.mrb[8].mxu1 }
 0x550   :  { %v360_v56 = vadd.f32 %v4002_v21, %v359_v54  ;;  %v3388_v57 = vpop.f32.mrb[9].mxu1 }
 0x551   :  { %v362_v58 = vpop.f32.mrb[10].mxu1 }
 0x552   :  { %v366_v60 = vmul.f32 %v365_v55, %v360_v56  ;;  %v459_v61 = vmul.f32 2.0, %v360_v56  ;;  %v3389_v62 = vpop.f32.mrb[11].mxu1 }
 0x554   :  { %v367_v63 = vadd.f32 %v366_v60, %v3954_v5  ;;  %v460_v0 = vadd.f32 %v459_v61, %v458_v59 }
 0x556   :  { %v368_v1 = vpack.c.bf16 %v367_v63, %v367_v63 }
 0x558   :  { %3393 = vmatmul.mubr.msk.bf16.vlgmr.msra.gmra.mrb[12].mxu0 %vm33_vm0, %v368_v1  ;;  %v737_v1 = vstv %s4070_s19  ;;  %s66_s19 = smul.f32 0.16666667, %s4500_s17 }
 0x559   :  { %3405 = vmatpush3.bf16.msra.mxu0 %v3944_v4  ;;  %3406 = vmatprep.mubr.msk.bf16.mxu0 %vm3888_vm1, %v3887_v3 }
 0x55a   :  { %3418 = vmatprep.subr.bf16.mxu0 %v3887_v3 }
 0x62b   :  { %v406_v2 = vpop.f32.mrb[12].mxu0 }
 0x62c   :  { %v407_v6 = vadd.f32 %v3986_v13, %v406_v2  ;;  %v3394_v7 = vpop.f32.mrb[13].mxu0 }
 0x62d   :  { %v409_v8 = vpop.f32.mrb[14].mxu0 }
 0x62e   :  { %3812 = vtanh.f32 %v407_v6  ;;  %v3395_v10 = vpop.f32.mrb[15].mxu0 }
 0x638   :  { %v3813_v11 = vpop.eup %3812 }
 0x639   :  { %v413_v14 = vpack.c.bf16 %v3813_v11, %v3813_v11 }
 0x63b   :  { %3401 = vmatmul.mubr.msk.bf16.vlgmr.msra.gmra.mrb[12].mxu1 %vm138_vm2, %v413_v14 }
 0x63c   :  { %3411 = vmatpush3.bf16.msra.mxu1 %v3969_v9  ;;  %3414 = vmatprep.mubr.msk.bf16.mxu1 %vm3888_vm1, %v3887_v3 }
 0x63d   :  { %3412 = vmatprep.subr.bf16.mxu1 %v3887_v3 }
 0x640   :  { %3413 = vmatpush3.bf16.msra.mxu1 %v3979_v12 }
 0x641   :  { %3424 = vmatprep.subr.bf16.mxu1 %v3887_v3 }
 0x70e   :  { %v451_v15 = vpop.f32.mrb[12].mxu1 }
 0x70f   :  { %v452_v16 = vadd.f32 %v4002_v21, %v451_v15  ;;  %v3402_v17 = vpop.f32.mrb[13].mxu1 }
 0x710   :  { %v454_v19 = vpop.f32.mrb[14].mxu1 }
 0x711   :  { %v461_v20 = vadd.f32 %v460_v0, %v452_v16  ;;  %v3403_v22 = vpop.f32.mrb[15].mxu1 }
 0x713   :  { %v463_v23 = vmul.f32 %v462_v18, %v461_v20 }
 0x715   :  { %v4053_v24 = vadd.f32 %v463_v23, %v3954_v5 }
 0x717   :  { %v465_v25 = vpack.c.bf16 %v4053_v24, %v4053_v24 }
 0x719   :  { %3407 = vmatmul.mubr.msk.bf16.vlgmr.msra.gmra.mrb[16].mxu0 %vm33_vm0, %v465_v25 }
 0x71a   :  { %3419 = vmatpush3.bf16.msra.mxu0 %v3944_v4  ;;  %3420 = vmatprep.mubr.msk.bf16.mxu0 %vm3888_vm1, %v3887_v3 }
 0x71b   :  { %3432 = vmatprep.subr.bf16.mxu0 %v3887_v3 }
 0x7ec   :  { %v503_v26 = vpop.f32.mrb[16].mxu0 }
 0x7ed   :  { %v504_v27 = vadd.f32 %v3986_v13, %v503_v26  ;;  %v3408_v28 = vpop.f32.mrb[17].mxu0 }
 0x7ee   :  { %v506_v29 = vpop.f32.mrb[18].mxu0 }
 0x7ef   :  { %3814 = vtanh.f32 %v504_v27  ;;  %v3409_v5 = vpop.f32.mrb[19].mxu0 }
 0x7f0   :  { %v834_v5 = vstv %s42_s21 }
 0x7f9   :  { %v3815_v30 = vpop.eup %3814 }
 0x7fa   :  { %v510_v31 = vpack.c.bf16 %v3815_v30, %v3815_v30 }
 0x7fc   :  { %3415 = vmatmul.mubr.msk.bf16.vlgmr.msra.gmra.mrb[16].mxu1 %vm138_vm2, %v510_v31 }
 0x7fd   :  { %3425 = vmatpush3.bf16.msra.mxu1 %v3969_v9  ;;  %3428 = vmatprep.mubr.msk.bf16.mxu1 %vm3888_vm1, %v3887_v3 }
 0x7fe   :  { %3426 = vmatprep.subr.bf16.mxu1 %v3887_v3 }
 0x801   :  { %3427 = vmatpush3.bf16.msra.mxu1 %v3979_v12 }
 0x802   :  { %3438 = vmatprep.subr.bf16.mxu1 %v3887_v3 }
 0x8cf   :  { %v548_v32 = vpop.f32.mrb[16].mxu1 }
 0x8d0   :  { %v549_v34 = vadd.f32 %v4002_v21, %v548_v32  ;;  %v3416_v35 = vpop.f32.mrb[17].mxu1 }
 0x8d1   :  { %v551_v36 = vpop.f32.mrb[18].mxu1 }
 0x8d2   :  { %v555_v37 = vmul.f32 %v554_v33, %v549_v34  ;;  %v3417_v38 = vpop.f32.mrb[19].mxu1 }
 0x8d4   :  { %v556_v39 = vadd.f32 %v555_v37, %v4053_v24 }
 0x8d6   :  { %v557_v40 = vpack.c.bf16 %v556_v39, %v556_v39 }
 0x8d8   :  { %3421 = vmatmul.mubr.msk.bf16.vlgmr.msra.gmra.mrb[20].mxu0 %vm33_vm0, %v557_v40 }
 0x8d9   :  { %3433 = vmatpush3.bf16.msra.mxu0 %v3944_v4  ;;  %3434 = vmatprep.mubr.msk.bf16.mxu0 %vm3888_vm1, %v3887_v3 }
 0x8da   :  { %3446 = vmatprep.subr.bf16.mxu0 %v3887_v3 }
 0x9ab   :  { %v595_v41 = vpop.f32.mrb[20].mxu0 }
 0x9ac   :  { %v596_v42 = vadd.f32 %v3986_v13, %v595_v41  ;;  %v3422_v43 = vpop.f32.mrb[21].mxu0 }
 0x9ad   :  { %v598_v44 = vpop.f32.mrb[22].mxu0 }
 0x9ae   :  { %3816 = vtanh.f32 %v596_v42  ;;  %v3423_v45 = vpop.f32.mrb[23].mxu0  ;;  %v926_v44 = vstv %s45_s24 }
 0x9b8   :  { %v3817_v46 = vpop.eup %3816 }
 0x9b9   :  { %v602_v47 = vpack.c.bf16 %v3817_v46, %v3817_v46 }
 0x9bb   :  { %3429 = vmatmul.mubr.msk.bf16.vlgmr.msra.gmra.mrb[20].mxu1 %vm138_vm2, %v602_v47 }
 0x9bc   :  { %3439 = vmatpush3.bf16.msra.mxu1 %v3969_v9  ;;  %3442 = vmatprep.mubr.msk.bf16.mxu1 %vm3888_vm1, %v3887_v3 }
 0x9bd   :  { %3440 = vmatprep.subr.bf16.mxu1 %v3887_v3 }
 0x9c0   :  { %3441 = vmatpush3.bf16.msra.mxu1 %v3979_v12 }
 0x9c1   :  { %3452 = vmatprep.subr.bf16.mxu1 %v3887_v3 }
 0xa8e   :  { %v640_v48 = vpop.f32.mrb[20].mxu1 }
 0xa8f   :  { %v641_v49 = vadd.f32 %v4002_v21, %v640_v48  ;;  %v3430_v50 = vpop.f32.mrb[21].mxu1 }
 0xa90   :  { %v643_v51 = vpop.f32.mrb[22].mxu1 }
 0xa91   :  { %v646_v52 = vmul.f32 %v641_v49, %v554_v33  ;;  %v3431_v53 = vpop.f32.mrb[23].mxu1  ;;  %v829_v63 = vmul.f32 2.0, %v641_v49 }
 0xa93   :  { %v647_v54 = vadd.f32 %v646_v52, %v4053_v24  ;;  %v830_v8 = vadd.f32 %v829_v63, %v549_v34 }
 0xa95   :  { %v648_v55 = vpack.c.bf16 %v647_v54, %v647_v54 }
 0xa97   :  { %3435 = vmatmul.mubr.msk.bf16.vlgmr.msra.gmra.mrb[24].mxu0 %vm33_vm0, %v648_v55 }
 0xa98   :  { %3447 = vmatpush3.bf16.msra.mxu0 %v3944_v4  ;;  %3448 = vmatprep.mubr.msk.bf16.mxu0 %vm3888_vm1, %v3887_v3 }
 0xa99   :  { %3460 = vmatprep.subr.bf16.mxu0 %v3887_v3 }
 0xb6a   :  { %v686_v56 = vpop.f32.mrb[24].mxu0 }
 0xb6b   :  { %v687_v57 = vadd.f32 %v3986_v13, %v686_v56  ;;  %v3436_v58 = vpop.f32.mrb[25].mxu0 }
 0xb6c   :  { %v689_v59 = vpop.f32.mrb[26].mxu0 }
 0xb6d   :  { %3818 = vtanh.f32 %v687_v57  ;;  %v3437_v60 = vpop.f32.mrb[27].mxu0 }
 0xb77   :  { %v3819_v61 = vpop.eup %3818 }
 0xb78   :  { %v693_v62 = vpack.c.bf16 %v3819_v61, %v3819_v61 }
 0xb7a   :  { %3443 = vmatmul.mubr.msk.bf16.vlgmr.msra.gmra.mrb[24].mxu1 %vm138_vm2, %v693_v62 }
 0xb7b   :  { %3453 = vmatpush3.bf16.msra.mxu1 %v3969_v9  ;;  %3456 = vmatprep.mubr.msk.bf16.mxu1 %vm3888_vm1, %v3887_v3 }
 0xb7c   :  { %3454 = vmatprep.subr.bf16.mxu1 %v3887_v3 }
 0xb7f   :  { %3455 = vmatpush3.bf16.msra.mxu1 %v3979_v12 }
 0xb80   :  { %3466 = vmatprep.subr.bf16.mxu1 %v3887_v3 }
 0xc4d   :  { %v731_v0 = vpop.f32.mrb[24].mxu1 }
 0xc4e   :  { %v732_v2 = vadd.f32 %v4002_v21, %v731_v0  ;;  %v3444_v6 = vpop.f32.mrb[25].mxu1 }
 0xc4f   :  { %v734_v7 = vpop.f32.mrb[26].mxu1 }
 0xc50   :  { %v738_v10 = vmul.f32 %v737_v1, %v732_v2  ;;  %v831_v11 = vmul.f32 2.0, %v732_v2  ;;  %v3445_v14 = vpop.f32.mrb[27].mxu1 }
 0xc52   :  { %v739_v15 = vadd.f32 %v738_v10, %v4053_v24  ;;  %v832_v16 = vadd.f32 %v831_v11, %v830_v8 }
 0xc54   :  { %v740_v17 = vpack.c.bf16 %v739_v15, %v739_v15 }
 0xc56   :  { %3449 = vmatmul.mubr.msk.bf16.vlgmr.msra.gmra.mrb[28].mxu0 %vm33_vm0, %v740_v17 }
 0xc57   :  { %3461 = vmatpush3.bf16.msra.mxu0 %v3944_v4  ;;  %3462 = vmatprep.mubr.msk.bf16.mxu0 %vm3888_vm1, %v3887_v3 }
 0xc58   :  { %3474 = vmatprep.subr.bf16.mxu0 %v3887_v3 }
 0xd29   :  { %v778_v18 = vpop.f32.mrb[28].mxu0 }
 0xd2a   :  { %v779_v19 = vadd.f32 %v3986_v13, %v778_v18  ;;  %v3450_v20 = vpop.f32.mrb[29].mxu0  ;;  %v1109_v18 = vstv %s4140_s23 }
 0xd2b   :  { %v781_v22 = vpop.f32.mrb[30].mxu0 }
 0xd2c   :  { %3820 = vtanh.f32 %v779_v19  ;;  %v3451_v23 = vpop.f32.mrb[31].mxu0 }
 0xd36   :  { %v3821_v25 = vpop.eup %3820 }
 0xd37   :  { %v785_v26 = vpack.c.bf16 %v3821_v25, %v3821_v25 }
 0xd39   :  { %3457 = vmatmul.mubr.msk.bf16.vlgmr.msra.gmra.mrb[28].mxu1 %vm138_vm2, %v785_v26 }
 0xd3a   :  { %3467 = vmatpush3.bf16.msra.mxu1 %v3969_v9  ;;  %3470 = vmatprep.mubr.msk.bf16.mxu1 %vm3888_vm1, %v3887_v3 }
 0xd3b   :  { %3468 = vmatprep.subr.bf16.mxu1 %v3887_v3 }
 0xd3e   :  { %3469 = vmatpush3.bf16.msra.mxu1 %v3979_v12 }
 0xd3f   :  { %3480 = vmatprep.subr.bf16.mxu1 %v3887_v3 }
 0xe0c   :  { %v823_v27 = vpop.f32.mrb[28].mxu1 }
 0xe0d   :  { %v824_v28 = vadd.f32 %v4002_v21, %v823_v27  ;;  %v3458_v29 = vpop.f32.mrb[29].mxu1 }
 0xe0e   :  { %v826_v30 = vpop.f32.mrb[30].mxu1 }
 0xe0f   :  { %v833_v31 = vadd.f32 %v832_v16, %v824_v28  ;;  %v3459_v32 = vpop.f32.mrb[31].mxu1 }
 0xe11   :  { %v835_v33 = vmul.f32 %v834_v5, %v833_v31 }
 0xe13   :  { %v4122_v34 = vadd.f32 %v835_v33, %v4053_v24 }
 0xe15   :  { %3070 = vrot.lane.b32.xlu0 %v4122_v34, %s3889_s22  ;;  %v837_v35 = vpack.c.bf16 %v4122_v34, %v4122_v34 }
 0xe17   :  { %3463 = vmatmul.mubr.msk.bf16.vlgmr.msra.gmra.mrb[32].mxu0 %vm33_vm0, %v837_v35 }
 0xe18   :  { %3475 = vmatpush3.bf16.msra.mxu0 %v3944_v4  ;;  %3476 = vmatprep.mubr.msk.bf16.mxu0 %vm3888_vm1, %v3887_v3 }
 0xe19   :  { %3488 = vmatprep.subr.bf16.mxu0 %v3887_v3 }
 0xeea   :  { %v875_v36 = vpop.f32.mrb[32].mxu0 }
 0xeeb   :  { %v876_v37 = vadd.f32 %v3986_v13, %v875_v36  ;;  %v3464_v38 = vpop.f32.mrb[33].mxu0 }
 0xeec   :  { %v878_v39 = vpop.f32.mrb[34].mxu0 }
 0xeed   :  { %3822 = vtanh.f32 %v876_v37  ;;  %v3465_v40 = vpop.f32.mrb[35].mxu0 }
 0xef7   :  { %v3823_v41 = vpop.eup %3822 }
 0xef8   :  { %v882_v42 = vpack.c.bf16 %v3823_v41, %v3823_v41  ;;  %v1206_v41 = vstv %s46_s25 }
 0xefa   :  { %3471 = vmatmul.mubr.msk.bf16.vlgmr.msra.gmra.mrb[32].mxu1 %vm138_vm2, %v882_v42 }
 0xefb   :  { %3481 = vmatpush3.bf16.msra.mxu1 %v3969_v9  ;;  %3484 = vmatprep.mubr.msk.bf16.mxu1 %vm3888_vm1, %v3887_v3 }
 0xefc   :  { %3482 = vmatprep.subr.bf16.mxu1 %v3887_v3 }
 0xeff   :  { %3483 = vmatpush3.bf16.msra.mxu1 %v3979_v12 }
 0xf00   :  { %3494 = vmatprep.subr.bf16.mxu1 %v3887_v3 }
 0xfcd   :  { %v920_v43 = vpop.f32.mrb[32].mxu1 }
 0xfce   :  { %v921_v45 = vadd.f32 %v4002_v21, %v920_v43  ;;  %v3472_v46 = vpop.f32.mrb[33].mxu1 }
 0xfcf   :  { %v923_v47 = vpop.f32.mrb[34].mxu1 }
 0xfd0   :  { %v927_v48 = vmul.f32 %v926_v44, %v921_v45  ;;  %v3473_v49 = vpop.f32.mrb[35].mxu1 }
 0xfd2   :  { %v928_v50 = vadd.f32 %v927_v48, %v4122_v34 }
 0xfd4   :  { %v929_v51 = vpack.c.bf16 %v928_v50, %v928_v50 }
 0xfd6   :  { %3477 = vmatmul.mubr.msk.bf16.vlgmr.msra.gmra.mrb[36].mxu0 %vm33_vm0, %v929_v51 }
 0xfd7   :  { %3489 = vmatpush3.bf16.msra.mxu0 %v3944_v4  ;;  %3490 = vmatprep.mubr.msk.bf16.mxu0 %vm3888_vm1, %v3887_v3 }
 0xfd8   :  { %3502 = vmatprep.subr.bf16.mxu0 %v3887_v3 }
0x10a9   :  { %v967_v52 = vpop.f32.mrb[36].mxu0 }
0x10aa   :  { %v968_v53 = vadd.f32 %v3986_v13, %v967_v52  ;;  %v3478_v54 = vpop.f32.mrb[37].mxu0 }
0x10ab   :  { %v970_v55 = vpop.f32.mrb[38].mxu0 }
0x10ac   :  { %3824 = vtanh.f32 %v968_v53  ;;  %v3479_v56 = vpop.f32.mrb[39].mxu0  ;;  %v1298_v55 = vstv %s49_s28 }
0x10b6   :  { %v3825_v57 = vpop.eup %3824 }
0x10b7   :  { %v974_v58 = vpack.c.bf16 %v3825_v57, %v3825_v57 }
0x10b9   :  { %3485 = vmatmul.mubr.msk.bf16.vlgmr.msra.gmra.mrb[36].mxu1 %vm138_vm2, %v974_v58 }
0x10ba   :  { %3495 = vmatpush3.bf16.msra.mxu1 %v3969_v9  ;;  %3498 = vmatprep.mubr.msk.bf16.mxu1 %vm3888_vm1, %v3887_v3 }
0x10bb   :  { %3496 = vmatprep.subr.bf16.mxu1 %v3887_v3 }
0x10be   :  { %3497 = vmatpush3.bf16.msra.mxu1 %v3979_v12 }
0x10bf   :  { %3508 = vmatprep.subr.bf16.mxu1 %v3887_v3 }
0x118c   :  { %v1012_v59 = vpop.f32.mrb[36].mxu1 }
0x118d   :  { %v1013_v60 = vadd.f32 %v4002_v21, %v1012_v59  ;;  %v3486_v61 = vpop.f32.mrb[37].mxu1 }
0x118e   :  { %v1015_v62 = vpop.f32.mrb[38].mxu1 }
0x118f   :  { %v1018_v63 = vmul.f32 %v1013_v60, %v926_v44  ;;  %v3487_v0 = vpop.f32.mrb[39].mxu1  ;;  %v1201_v16 = vmul.f32 2.0, %v1013_v60 }
0x1191   :  { %v1019_v1 = vadd.f32 %v1018_v63, %v4122_v34  ;;  %v1202_v23 = vadd.f32 %v1201_v16, %v921_v45 }
0x1193   :  { %v1020_v2 = vpack.c.bf16 %v1019_v1, %v1019_v1 }
0x1195   :  { %3491 = vmatmul.mubr.msk.bf16.vlgmr.msra.gmra.mrb[40].mxu0 %vm33_vm0, %v1020_v2 }
0x1196   :  { %3503 = vmatpush3.bf16.msra.mxu0 %v3944_v4  ;;  %3504 = vmatprep.mubr.msk.bf16.mxu0 %vm3888_vm1, %v3887_v3 }
0x1197   :  { %3516 = vmatprep.subr.bf16.mxu0 %v3887_v3 }
0x1268   :  { %v1058_v6 = vpop.f32.mrb[40].mxu0 }
0x1269   :  { %v1059_v7 = vadd.f32 %v3986_v13, %v1058_v6  ;;  %v3492_v8 = vpop.f32.mrb[41].mxu0 }
0x126a   :  { %v1061_v10 = vpop.f32.mrb[42].mxu0 }
0x126b   :  { %3826 = vtanh.f32 %v1059_v7  ;;  %v3493_v11 = vpop.f32.mrb[43].mxu0 }
0x1275   :  { %v3827_v14 = vpop.eup %3826 }
0x1276   :  { %v1065_v15 = vpack.c.bf16 %v3827_v14, %v3827_v14 }
0x1278   :  { %3499 = vmatmul.mubr.msk.bf16.vlgmr.msra.gmra.mrb[40].mxu1 %vm138_vm2, %v1065_v15 }
0x1279   :  { %3509 = vmatpush3.bf16.msra.mxu1 %v3969_v9  ;;  %3512 = vmatprep.mubr.msk.bf16.mxu1 %vm3888_vm1, %v3887_v3 }
0x127a   :  { %3510 = vmatprep.subr.bf16.mxu1 %v3887_v3 }
0x127d   :  { %3511 = vmatpush3.bf16.msra.mxu1 %v3979_v12 }
0x127e   :  { %3522 = vmatprep.subr.bf16.mxu1 %v3887_v3 }
0x134b   :  { %v1103_v17 = vpop.f32.mrb[40].mxu1 }
0x134c   :  { %v1104_v19 = vadd.f32 %v4002_v21, %v1103_v17  ;;  %v3500_v20 = vpop.f32.mrb[41].mxu1 }
0x134d   :  { %v1106_v22 = vpop.f32.mrb[42].mxu1 }
0x134e   :  { %v1110_v25 = vmul.f32 %v1109_v18, %v1104_v19  ;;  %v1203_v26 = vmul.f32 2.0, %v1104_v19  ;;  %v3501_v27 = vpop.f32.mrb[43].mxu1 }
0x1350   :  { %v1111_v28 = vadd.f32 %v1110_v25, %v4122_v34  ;;  %v1204_v29 = vadd.f32 %v1203_v26, %v1202_v23 }
0x1352   :  { %v1112_v5 = vpack.c.bf16 %v1111_v28, %v1111_v28 }
0x1354   :  { %3505 = vmatmul.mubr.msk.bf16.vlgmr.msra.gmra.mrb[44].mxu0 %vm33_vm0, %v1112_v5 }
0x1355   :  { %3517 = vmatpush3.bf16.msra.mxu0 %v3944_v4  ;;  %3518 = vmatprep.mubr.msk.bf16.mxu0 %vm3888_vm1, %v3887_v3 }
0x1356   :  { %3530 = vmatprep.subr.bf16.mxu0 %v3887_v3 }
0x1427   :  { %v1150_v30 = vpop.f32.mrb[44].mxu0 }
0x1428   :  { %v1151_v31 = vadd.f32 %v3986_v13, %v1150_v30  ;;  %v3506_v32 = vpop.f32.mrb[45].mxu0  ;;  %v1481_v30 = vstv %s4210_s27 }
0x1429   :  { %v1153_v33 = vpop.f32.mrb[46].mxu0 }
0x142a   :  { %3828 = vtanh.f32 %v1151_v31  ;;  %v3507_v35 = vpop.f32.mrb[47].mxu0 }
0x1434   :  { %v3829_v36 = vpop.eup %3828 }
0x1435   :  { %v1157_v37 = vpack.c.bf16 %v3829_v36, %v3829_v36 }
0x1437   :  { %3513 = vmatmul.mubr.msk.bf16.vlgmr.msra.gmra.mrb[44].mxu1 %vm138_vm2, %v1157_v37 }
0x1438   :  { %3523 = vmatpush3.bf16.msra.mxu1 %v3969_v9  ;;  %3526 = vmatprep.mubr.msk.bf16.mxu1 %vm3888_vm1, %v3887_v3 }
0x1439   :  { %3524 = vmatprep.subr.bf16.mxu1 %v3887_v3 }
0x143c   :  { %3525 = vmatpush3.bf16.msra.mxu1 %v3979_v12 }
0x143d   :  { %3536 = vmatprep.subr.bf16.mxu1 %v3887_v3 }
0x150a   :  { %v1195_v38 = vpop.f32.mrb[44].mxu1 }
0x150b   :  { %v1196_v39 = vadd.f32 %v4002_v21, %v1195_v38  ;;  %v3514_v40 = vpop.f32.mrb[45].mxu1 }
0x150c   :  { %v1198_v42 = vpop.f32.mrb[46].mxu1 }
0x150d   :  { %v1205_v43 = vadd.f32 %v1204_v29, %v1196_v39  ;;  %v3515_v44 = vpop.f32.mrb[47].mxu1 }
0x150f   :  { %v1207_v45 = vmul.f32 %v1206_v41, %v1205_v43 }
0x1511   :  { %v4192_v46 = vadd.f32 %v1207_v45, %v4122_v34 }
0x1513   :  { %3074 = vrot.lane.b32.xlu0 %v4192_v46, %s3890_s26  ;;  %v1209_v47 = vpack.c.bf16 %v4192_v46, %v4192_v46 }
0x1515   :  { %3519 = vmatmul.mubr.msk.bf16.vlgmr.msra.gmra.mrb[48].mxu0 %vm33_vm0, %v1209_v47 }
0x1516   :  { %3531 = vmatpush3.bf16.msra.mxu0 %v3944_v4  ;;  %3532 = vmatprep.mubr.msk.bf16.mxu0 %vm3888_vm1, %v3887_v3 }
0x1517   :  { %3544 = vmatprep.subr.bf16.mxu0 %v3887_v3 }
0x15e8   :  { %v1247_v48 = vpop.f32.mrb[48].mxu0 }
0x15e9   :  { %v1248_v49 = vadd.f32 %v3986_v13, %v1247_v48  ;;  %v3520_v34 = vpop.f32.mrb[49].mxu0 }
0x15ea   :  { %v1250_v50 = vpop.f32.mrb[50].mxu0 }
0x15eb   :  { %3830 = vtanh.f32 %v1248_v49  ;;  %v3521_v51 = vpop.f32.mrb[51].mxu0 }
0x15f5   :  { %v3831_v52 = vpop.eup %3830 }
0x15f6   :  { %v1254_v53 = vpack.c.bf16 %v3831_v52, %v3831_v52  ;;  %v1578_v52 = vstv %s50_s29 }
0x15f8   :  { %3527 = vmatmul.mubr.msk.bf16.vlgmr.msra.gmra.mrb[48].mxu1 %vm138_vm2, %v1254_v53 }
0x15f9   :  { %3537 = vmatpush3.bf16.msra.mxu1 %v3969_v9  ;;  %3540 = vmatprep.mubr.msk.bf16.mxu1 %vm3888_vm1, %v3887_v3 }
0x15fa   :  { %3538 = vmatprep.subr.bf16.mxu1 %v3887_v3 }
0x15fd   :  { %3539 = vmatpush3.bf16.msra.mxu1 %v3979_v12 }
0x15fe   :  { %3550 = vmatprep.subr.bf16.mxu1 %v3887_v3 }
0x16cb   :  { %v1292_v54 = vpop.f32.mrb[48].mxu1 }
0x16cc   :  { %v1293_v56 = vadd.f32 %v4002_v21, %v1292_v54  ;;  %v3528_v57 = vpop.f32.mrb[49].mxu1 }
0x16cd   :  { %v1295_v58 = vpop.f32.mrb[50].mxu1 }
0x16ce   :  { %v1299_v59 = vmul.f32 %v1298_v55, %v1293_v56  ;;  %v3529_v60 = vpop.f32.mrb[51].mxu1 }
0x16d0   :  { %v1300_v61 = vadd.f32 %v1299_v59, %v4192_v46 }
0x16d2   :  { %v1301_v62 = vpack.c.bf16 %v1300_v61, %v1300_v61 }
0x16d4   :  { %3533 = vmatmul.mubr.msk.bf16.vlgmr.msra.gmra.mrb[52].mxu0 %vm33_vm0, %v1301_v62 }
0x16d5   :  { %3545 = vmatpush3.bf16.msra.mxu0 %v3944_v4  ;;  %3546 = vmatprep.mubr.msk.bf16.mxu0 %vm3888_vm1, %v3887_v3 }
0x16d6   :  { %3558 = vmatprep.subr.bf16.mxu0 %v3887_v3 }
0x17a7   :  { %v1339_v63 = vpop.f32.mrb[52].mxu0 }
0x17a8   :  { %v1340_v0 = vadd.f32 %v3986_v13, %v1339_v63  ;;  %v3534_v1 = vpop.f32.mrb[53].mxu0 }
0x17a9   :  { %v1342_v2 = vpop.f32.mrb[54].mxu0 }
0x17aa   :  { %3832 = vtanh.f32 %v1340_v0  ;;  %v3535_v6 = vpop.f32.mrb[55].mxu0  ;;  %v1670_v2 = vstv %s53_s1 }
0x17b4   :  { %v3833_v7 = vpop.eup %3832 }
0x17b5   :  { %v1346_v8 = vpack.c.bf16 %v3833_v7, %v3833_v7 }
0x17b7   :  { %3541 = vmatmul.mubr.msk.bf16.vlgmr.msra.gmra.mrb[52].mxu1 %vm138_vm2, %v1346_v8 }
0x17b8   :  { %3551 = vmatpush3.bf16.msra.mxu1 %v3969_v9  ;;  %3554 = vmatprep.mubr.msk.bf16.mxu1 %vm3888_vm1, %v3887_v3 }
0x17b9   :  { %3552 = vmatprep.subr.bf16.mxu1 %v3887_v3 }
0x17bc   :  { %3553 = vmatpush3.bf16.msra.mxu1 %v3979_v12 }
0x17bd   :  { %3564 = vmatprep.subr.bf16.mxu1 %v3887_v3 }
0x188a   :  { %v1384_v10 = vpop.f32.mrb[52].mxu1 }
0x188b   :  { %v1385_v11 = vadd.f32 %v4002_v21, %v1384_v10  ;;  %v3542_v14 = vpop.f32.mrb[53].mxu1 }
0x188c   :  { %v1387_v15 = vpop.f32.mrb[54].mxu1 }
0x188d   :  { %v1390_v16 = vmul.f32 %v1385_v11, %v1298_v55  ;;  %v3543_v17 = vpop.f32.mrb[55].mxu1  ;;  %v1573_v29 = vmul.f32 2.0, %v1385_v11 }
0x188f   :  { %v1391_v18 = vadd.f32 %v1390_v16, %v4192_v46  ;;  %v1574_v35 = vadd.f32 %v1573_v29, %v1293_v56 }
0x1891   :  { %v1392_v19 = vpack.c.bf16 %v1391_v18, %v1391_v18 }
0x1893   :  { %3547 = vmatmul.mubr.msk.bf16.vlgmr.msra.gmra.mrb[56].mxu0 %vm33_vm0, %v1392_v19 }
0x1894   :  { %3559 = vmatpush3.bf16.msra.mxu0 %v3944_v4  ;;  %3560 = vmatprep.mubr.msk.bf16.mxu0 %vm3888_vm1, %v3887_v3 }
0x1895   :  { %3572 = vmatprep.subr.bf16.mxu0 %v3887_v3 }
0x1966   :  { %v1430_v20 = vpop.f32.mrb[56].mxu0 }
0x1967   :  { %v1431_v22 = vadd.f32 %v3986_v13, %v1430_v20  ;;  %v3548_v23 = vpop.f32.mrb[57].mxu0 }
0x1968   :  { %v1433_v25 = vpop.f32.mrb[58].mxu0 }
0x1969   :  { %3834 = vtanh.f32 %v1431_v22  ;;  %v3549_v26 = vpop.f32.mrb[59].mxu0 }
0x1973   :  { %v3835_v27 = vpop.eup %3834 }
0x1974   :  { %v1437_v28 = vpack.c.bf16 %v3835_v27, %v3835_v27 }
0x1976   :  { %3555 = vmatmul.mubr.msk.bf16.vlgmr.msra.gmra.mrb[56].mxu1 %vm138_vm2, %v1437_v28 }
0x1977   :  { %3565 = vmatpush3.bf16.msra.mxu1 %v3969_v9  ;;  %3568 = vmatprep.mubr.msk.bf16.mxu1 %vm3888_vm1, %v3887_v3 }
0x1978   :  { %3566 = vmatprep.subr.bf16.mxu1 %v3887_v3 }
0x197b   :  { %3567 = vmatpush3.bf16.msra.mxu1 %v3979_v12 }
0x197c   :  { %3578 = vmatprep.subr.bf16.mxu1 %v3887_v3 }
0x1a49   :  { %v1475_v5 = vpop.f32.mrb[56].mxu1 }
0x1a4a   :  { %v1476_v31 = vadd.f32 %v4002_v21, %v1475_v5  ;;  %v3556_v32 = vpop.f32.mrb[57].mxu1 }
0x1a4b   :  { %v1478_v33 = vpop.f32.mrb[58].mxu1 }
0x1a4c   :  { %v1482_v36 = vmul.f32 %v1481_v30, %v1476_v31  ;;  %v1575_v37 = vmul.f32 2.0, %v1476_v31  ;;  %v3557_v38 = vpop.f32.mrb[59].mxu1 }
0x1a4e   :  { %v1483_v39 = vadd.f32 %v1482_v36, %v4192_v46  ;;  %v1576_v40 = vadd.f32 %v1575_v37, %v1574_v35 }
0x1a50   :  { %v1484_v41 = vpack.c.bf16 %v1483_v39, %v1483_v39 }
0x1a52   :  { %3561 = vmatmul.mubr.msk.bf16.vlgmr.msra.gmra.mrb[60].mxu0 %vm33_vm0, %v1484_v41  ;;  %v1853_v41 = vstv %s4280_s30 }
0x1a53   :  { %3573 = vmatpush3.bf16.msra.mxu0 %v3944_v4  ;;  %3574 = vmatprep.mubr.msk.bf16.mxu0 %vm3888_vm1, %v3887_v3 }
0x1a54   :  { %3586 = vmatprep.subr.bf16.mxu0 %v3887_v3 }
0x1b25   :  { %v1522_v42 = vpop.f32.mrb[60].mxu0 }
0x1b26   :  { %v1523_v43 = vadd.f32 %v3986_v13, %v1522_v42  ;;  %v3562_v44 = vpop.f32.mrb[61].mxu0  ;;  %v4322_v42 = vld [vmem:[%s4552_s5] ss:$0 sm:$0xff]  ;;  %s54_s5 = smul.f32 0.16666667, %s4280_s30 }
0x1b27   :  { %v1525_v45 = vpop.f32.mrb[62].mxu0 }
0x1b28   :  { %3836 = vtanh.f32 %v1523_v43  ;;  %v3563_v47 = vpop.f32.mrb[63].mxu0 }
0x1b32   :  { %v3837_v48 = vpop.eup %3836 }
0x1b33   :  { %v1529_v49 = vpack.c.bf16 %v3837_v48, %v3837_v48 }
0x1b35   :  { %3569 = vmatmul.mubr.msk.bf16.vlgmr.msra.gmra.mrb[60].mxu1 %vm138_vm2, %v1529_v49 }
0x1b36   :  { %3579 = vmatpush3.bf16.msra.mxu1 %v3969_v9  ;;  %3582 = vmatprep.mubr.msk.bf16.mxu1 %vm3888_vm1, %v3887_v3 }
0x1b37   :  { %3580 = vmatprep.subr.bf16.mxu1 %v3887_v3 }
0x1b3a   :  { %3581 = vmatpush3.bf16.msra.mxu1 %v3979_v12 }
0x1b3b   :  { %3592 = vmatprep.subr.bf16.mxu1 %v3887_v3 }
0x1c08   :  { %v1567_v34 = vpop.f32.mrb[60].mxu1 }
0x1c09   :  { %v1568_v50 = vadd.f32 %v4002_v21, %v1567_v34  ;;  %v3570_v51 = vpop.f32.mrb[61].mxu1 }
0x1c0a   :  { %v1570_v53 = vpop.f32.mrb[62].mxu1 }
0x1c0b   :  { %v1577_v54 = vadd.f32 %v1576_v40, %v1568_v50  ;;  %v3571_v55 = vpop.f32.mrb[63].mxu1 }
0x1c0d   :  { %v1579_v56 = vmul.f32 %v1578_v52, %v1577_v54 }
0x1c0f   :  { %v4262_v57 = vadd.f32 %v1579_v56, %v4192_v46 }
0x1c11   :  { %3078 = vrot.lane.b32.xlu1 %v4262_v57, %s3891_s0  ;;  %v1581_v58 = vpack.c.bf16 %v4262_v57, %v4262_v57 }
0x1c13   :  { %3575 = vmatmul.mubr.msk.bf16.vlgmr.msra.gmra.mrb[64].mxu0 %vm33_vm0, %v1581_v58 }
0x1c14   :  { %3587 = vmatpush3.bf16.msra.mxu0 %v3944_v4  ;;  %3588 = vmatprep.mubr.msk.bf16.mxu0 %vm3888_vm1, %v3887_v3 }
0x1c15   :  { %3600 = vmatprep.subr.bf16.mxu0 %v3887_v3 }
0x1ce6   :  { %v1619_v59 = vpop.f32.mrb[64].mxu0 }
0x1ce7   :  { %v1620_v60 = vadd.f32 %v3986_v13, %v1619_v59  ;;  %v3576_v46 = vpop.f32.mrb[65].mxu0 }
0x1ce8   :  { %v1622_v61 = vpop.f32.mrb[66].mxu0 }
0x1ce9   :  { %3838 = vtanh.f32 %v1620_v60  ;;  %v3577_v62 = vpop.f32.mrb[67].mxu0 }
0x1cf3   :  { %v3839_v63 = vpop.eup %3838 }
0x1cf4   :  { %v1626_v0 = vpack.c.bf16 %v3839_v63, %v3839_v63  ;;  %v1950_v63 = vstv %s54_s5 }
0x1cf6   :  { %3583 = vmatmul.mubr.msk.bf16.vlgmr.msra.gmra.mrb[64].mxu1 %vm138_vm2, %v1626_v0 }
0x1cf7   :  { %3593 = vmatpush3.bf16.msra.mxu1 %v3969_v9  ;;  %3596 = vmatprep.mubr.msk.bf16.mxu1 %vm3888_vm1, %v3887_v3 }
0x1cf8   :  { %3594 = vmatprep.subr.bf16.mxu1 %v3887_v3 }
0x1cfb   :  { %3595 = vmatpush3.bf16.msra.mxu1 %v3979_v12 }
0x1cfc   :  { %3606 = vmatprep.subr.bf16.mxu1 %v3887_v3 }
0x1dc9   :  { %v1664_v1 = vpop.f32.mrb[64].mxu1 }
0x1dca   :  { %v1665_v6 = vadd.f32 %v4002_v21, %v1664_v1  ;;  %v3584_v7 = vpop.f32.mrb[65].mxu1 }
0x1dcb   :  { %v1667_v8 = vpop.f32.mrb[66].mxu1 }
0x1dcc   :  { %v1671_v10 = vmul.f32 %v1670_v2, %v1665_v6  ;;  %v3585_v11 = vpop.f32.mrb[67].mxu1 }
0x1dce   :  { %v1672_v14 = vadd.f32 %v1671_v10, %v4262_v57 }
0x1dd0   :  { %v1673_v15 = vpack.c.bf16 %v1672_v14, %v1672_v14 }
0x1dd2   :  { %3589 = vmatmul.mubr.msk.bf16.vlgmr.msra.gmra.mrb[68].mxu0 %vm33_vm0, %v1673_v15 }
0x1dd3   :  { %3601 = vmatpush3.bf16.msra.mxu0 %v3944_v4  ;;  %3602 = vmatprep.mubr.msk.bf16.mxu0 %vm3888_vm1, %v3887_v3 }
0x1dd4   :  { %3614 = vmatprep.subr.bf16.mxu0 %v3887_v3 }
0x1ea5   :  { %v1711_v16 = vpop.f32.mrb[68].mxu0 }
0x1ea6   :  { %v1712_v17 = vadd.f32 %v3986_v13, %v1711_v16  ;;  %v3590_v18 = vpop.f32.mrb[69].mxu0 }
0x1ea7   :  { %v1714_v19 = vpop.f32.mrb[70].mxu0 }
0x1ea8   :  { %3840 = vtanh.f32 %v1712_v17  ;;  %v3591_v20 = vpop.f32.mrb[71].mxu0  ;;  %v2042_v19 = vstv %s57_s11 }
0x1eb2   :  { %v3841_v22 = vpop.eup %3840 }
0x1eb3   :  { %v1718_v23 = vpack.c.bf16 %v3841_v22, %v3841_v22 }
0x1eb5   :  { %3597 = vmatmul.mubr.msk.bf16.vlgmr.msra.gmra.mrb[68].mxu1 %vm138_vm2, %v1718_v23 }
0x1eb6   :  { %3607 = vmatpush3.bf16.msra.mxu1 %v3969_v9  ;;  %3610 = vmatprep.mubr.msk.bf16.mxu1 %vm3888_vm1, %v3887_v3 }
0x1eb7   :  { %3608 = vmatprep.subr.bf16.mxu1 %v3887_v3 }
0x1eba   :  { %3609 = vmatpush3.bf16.msra.mxu1 %v3979_v12 }
0x1ebb   :  { %3620 = vmatprep.subr.bf16.mxu1 %v3887_v3 }
0x1f88   :  { %v1756_v13 = vpop.f32.mrb[68].mxu1 }
0x1f89   :  { %v1757_v25 = vadd.f32 %v4002_v21, %v1756_v13  ;;  %v3598_v26 = vpop.f32.mrb[69].mxu1  ;;  %v4308_v21 = vld [vmem:[%s4550_s3] ss:$0 sm:$0xff] }
0x1f8a   :  { %v1759_v27 = vpop.f32.mrb[70].mxu1 }
0x1f8b   :  { %v1762_v28 = vmul.f32 %v1757_v25, %v1670_v2  ;;  %v3599_v29 = vpop.f32.mrb[71].mxu1  ;;  %v1945_v39 = vmul.f32 2.0, %v1757_v25 }
0x1f8d   :  { %v1763_v5 = vadd.f32 %v1762_v28, %v4262_v57  ;;  %v1946_v47 = vadd.f32 %v1945_v39, %v1665_v6 }
0x1f8f   :  { %v1764_v30 = vpack.c.bf16 %v1763_v5, %v1763_v5 }
0x1f91   :  { %3603 = vmatmul.mubr.msk.bf16.vlgmr.msra.gmra.mrb[72].mxu0 %vm33_vm0, %v1764_v30 }
0x1f92   :  { %3615 = vmatpush3.bf16.msra.mxu0 %v3944_v4  ;;  %3616 = vmatprep.mubr.msk.bf16.mxu0 %vm3888_vm1, %v3887_v3 }
0x1f93   :  { %3628 = vmatprep.subr.bf16.mxu0 %v3887_v3 }
0x2064   :  { %v1802_v31 = vpop.f32.mrb[72].mxu0 }
0x2065   :  { %v1803_v32 = vadd.f32 %v4308_v21, %v1802_v31  ;;  %v3604_v33 = vpop.f32.mrb[73].mxu0 }
0x2066   :  { %v1805_v35 = vpop.f32.mrb[74].mxu0 }
0x2067   :  { %3842 = vtanh.f32 %v1803_v32  ;;  %v3605_v36 = vpop.f32.mrb[75].mxu0 }
0x2071   :  { %v3843_v37 = vpop.eup %3842 }
0x2072   :  { %v1809_v38 = vpack.c.bf16 %v3843_v37, %v3843_v37 }
0x2074   :  { %3611 = vmatmul.mubr.msk.bf16.vlgmr.msra.gmra.mrb[72].mxu1 %vm138_vm2, %v1809_v38 }
0x2075   :  { %3621 = vmatpush3.bf16.msra.mxu1 %v3969_v9  ;;  %3624 = vmatprep.mubr.msk.bf16.mxu1 %vm3888_vm1, %v3887_v3 }
0x2076   :  { %3622 = vmatprep.subr.bf16.mxu1 %v3887_v3 }
0x2079   :  { %3623 = vmatpush3.bf16.msra.mxu1 %v3979_v12 }
0x207a   :  { %3634 = vmatprep.subr.bf16.mxu1 %v3887_v3 }
0x2147   :  { %v1847_v40 = vpop.f32.mrb[72].mxu1 }
0x2148   :  { %v1848_v43 = vadd.f32 %v4322_v42, %v1847_v40  ;;  %v3612_v44 = vpop.f32.mrb[73].mxu1 }
0x2149   :  { %v1850_v45 = vpop.f32.mrb[74].mxu1 }
0x214a   :  { %v1854_v48 = vmul.f32 %v1853_v41, %v1848_v43  ;;  %v1947_v49 = vmul.f32 2.0, %v1848_v43  ;;  %v3613_v34 = vpop.f32.mrb[75].mxu1 }
0x214c   :  { %v1855_v50 = vadd.f32 %v1854_v48, %v4262_v57  ;;  %v1948_v51 = vadd.f32 %v1947_v49, %v1946_v47 }
0x214e   :  { %v1856_v52 = vpack.c.bf16 %v1855_v50, %v1855_v50 }
0x2150   :  { %3617 = vmatmul.mubr.msk.bf16.vlgmr.msra.gmra.mrb[76].mxu0 %vm33_vm0, %v1856_v52 }
0x2151   :  { %3629 = vmatpush3.bf16.msra.mxu0 %v3944_v4  ;;  %3630 = vmatprep.mubr.msk.bf16.mxu0 %vm3888_vm1, %v3887_v3 }
0x2152   :  { %3642 = vmatprep.subr.bf16.mxu0 %v3887_v3 }
0x2223   :  { %v1894_v53 = vpop.f32.mrb[76].mxu0 }
0x2224   :  { %v1895_v54 = vadd.f32 %v4308_v21, %v1894_v53  ;;  %v3618_v55 = vpop.f32.mrb[77].mxu0  ;;  %v2225_v53 = vstv %s4360_s10 }
0x2225   :  { %v1897_v56 = vpop.f32.mrb[78].mxu0 }
0x2226   :  { %3844 = vtanh.f32 %v1895_v54  ;;  %v3619_v58 = vpop.f32.mrb[79].mxu0 }
0x2230   :  { %v3845_v59 = vpop.eup %3844 }
0x2231   :  { %v1901_v60 = vpack.c.bf16 %v3845_v59, %v3845_v59 }
0x2233   :  { %3625 = vmatmul.mubr.msk.bf16.vlgmr.msra.gmra.mrb[76].mxu1 %vm138_vm2, %v1901_v60 }
0x2234   :  { %3635 = vmatpush3.bf16.msra.mxu1 %v3969_v9  ;;  %3638 = vmatprep.mubr.msk.bf16.mxu1 %vm3888_vm1, %v3887_v3 }
0x2235   :  { %3636 = vmatprep.subr.bf16.mxu1 %v3887_v3 }
0x2238   :  { %3637 = vmatpush3.bf16.msra.mxu1 %v3979_v12 }
0x2239   :  { %3648 = vmatprep.subr.bf16.mxu1 %v3887_v3 }
0x2306   :  { %v1939_v46 = vpop.f32.mrb[76].mxu1 }
0x2307   :  { %v1940_v61 = vadd.f32 %v4322_v42, %v1939_v46  ;;  %v3626_v62 = vpop.f32.mrb[77].mxu1 }
0x2308   :  { %v1942_v0 = vpop.f32.mrb[78].mxu1 }
0x2309   :  { %v1949_v1 = vadd.f32 %v1948_v51, %v1940_v61  ;;  %v3627_v2 = vpop.f32.mrb[79].mxu1 }
0x230b   :  { %v1951_v6 = vmul.f32 %v1950_v63, %v1949_v1 }
0x230d   :  { %v4342_v7 = vadd.f32 %v1951_v6, %v4262_v57 }
0x230f   :  { %3082 = vrot.lane.b32.xlu1 %v4342_v7, %s3892_s9  ;;  %v1953_v8 = vpack.c.bf16 %v4342_v7, %v4342_v7 }
0x2311   :  { %3631 = vmatmul.mubr.msk.bf16.vlgmr.msra.gmra.mrb[80].mxu0 %vm33_vm0, %v1953_v8 }
0x2312   :  { %3643 = vmatpush3.bf16.msra.mxu0 %v3944_v4  ;;  %3644 = vmatprep.mubr.msk.bf16.mxu0 %vm3888_vm1, %v3887_v3 }
0x2313   :  { %3656 = vmatprep.subr.bf16.mxu0 %v3887_v3 }
0x23e4   :  { %v1991_v10 = vpop.f32.mrb[80].mxu0 }
0x23e5   :  { %v1992_v11 = vadd.f32 %v4308_v21, %v1991_v10  ;;  %v3632_v57 = vpop.f32.mrb[81].mxu0 }
0x23e6   :  { %v1994_v14 = vpop.f32.mrb[82].mxu0 }
0x23e7   :  { %3846 = vtanh.f32 %v1992_v11  ;;  %v3633_v15 = vpop.f32.mrb[83].mxu0 }
0x23f1   :  { %v3847_v16 = vpop.eup %3846 }
0x23f2   :  { %v1998_v17 = vpack.c.bf16 %v3847_v16, %v3847_v16  ;;  %v2322_v16 = vstv %s58_s12 }
0x23f4   :  { %3639 = vmatmul.mubr.msk.bf16.vlgmr.msra.gmra.mrb[80].mxu1 %vm138_vm2, %v1998_v17 }
0x23f5   :  { %3649 = vmatpush3.bf16.msra.mxu1 %v3969_v9  ;;  %3652 = vmatprep.mubr.msk.bf16.mxu1 %vm3888_vm1, %v3887_v3 }
0x23f6   :  { %3650 = vmatprep.subr.bf16.mxu1 %v3887_v3 }
0x23f9   :  { %3651 = vmatpush3.bf16.msra.mxu1 %v3979_v12 }
0x23fa   :  { %3662 = vmatprep.subr.bf16.mxu1 %v3887_v3 }
0x24c7   :  { %v2036_v18 = vpop.f32.mrb[80].mxu1 }
0x24c8   :  { %v2037_v20 = vadd.f32 %v4322_v42, %v2036_v18  ;;  %v3640_v22 = vpop.f32.mrb[81].mxu1 }
0x24c9   :  { %v2039_v23 = vpop.f32.mrb[82].mxu1 }
0x24ca   :  { %v2043_v13 = vmul.f32 %v2042_v19, %v2037_v20  ;;  %v3641_v25 = vpop.f32.mrb[83].mxu1 }
0x24cc   :  { %v2044_v26 = vadd.f32 %v2043_v13, %v4342_v7 }
0x24ce   :  { %v2045_v27 = vpack.c.bf16 %v2044_v26, %v2044_v26 }
0x24d0   :  { %3645 = vmatmul.mubr.msk.bf16.vlgmr.msra.gmra.mrb[84].mxu0 %vm33_vm0, %v2045_v27 }
0x24d1   :  { %3657 = vmatpush3.bf16.msra.mxu0 %v3944_v4  ;;  %3658 = vmatprep.mubr.msk.bf16.mxu0 %vm3888_vm1, %v3887_v3 }
0x24d2   :  { %3670 = vmatprep.subr.bf16.mxu0 %v3887_v3 }
0x25a3   :  { %v2083_v28 = vpop.f32.mrb[84].mxu0 }
0x25a4   :  { %v2084_v29 = vadd.f32 %v4308_v21, %v2083_v28  ;;  %v3646_v5 = vpop.f32.mrb[85].mxu0 }
0x25a5   :  { %v2086_v30 = vpop.f32.mrb[86].mxu0 }
0x25a6   :  { %3848 = vtanh.f32 %v2084_v29  ;;  %v3647_v31 = vpop.f32.mrb[87].mxu0  ;;  %v2414_v30 = vstv %s61_s4 }
0x25b0   :  { %v3849_v32 = vpop.eup %3848 }
0x25b1   :  { %v2090_v33 = vpack.c.bf16 %v3849_v32, %v3849_v32 }
0x25b3   :  { %3653 = vmatmul.mubr.msk.bf16.vlgmr.msra.gmra.mrb[84].mxu1 %vm138_vm2, %v2090_v33 }
0x25b4   :  { %3663 = vmatpush3.bf16.msra.mxu1 %v3969_v9  ;;  %3666 = vmatprep.mubr.msk.bf16.mxu1 %vm3888_vm1, %v3887_v3 }
0x25b5   :  { %3664 = vmatprep.subr.bf16.mxu1 %v3887_v3 }
0x25b8   :  { %3665 = vmatpush3.bf16.msra.mxu1 %v3979_v12 }
0x25b9   :  { %3676 = vmatprep.subr.bf16.mxu1 %v3887_v3 }
0x2686   :  { %v2128_v35 = vpop.f32.mrb[84].mxu1 }
0x2687   :  { %v2129_v36 = vadd.f32 %v4322_v42, %v2128_v35  ;;  %v3654_v37 = vpop.f32.mrb[85].mxu1 }
0x2688   :  { %v2131_v38 = vpop.f32.mrb[86].mxu1 }
0x2689   :  { %v2134_v39 = vmul.f32 %v2129_v36, %v2042_v19  ;;  %v3655_v40 = vpop.f32.mrb[87].mxu1  ;;  %v2317_v51 = vmul.f32 2.0, %v2129_v36 }
0x268b   :  { %v2135_v41 = vadd.f32 %v2134_v39, %v4342_v7  ;;  %v2318_v58 = vadd.f32 %v2317_v51, %v2037_v20 }
0x268d   :  { %v2136_v43 = vpack.c.bf16 %v2135_v41, %v2135_v41 }
0x268f   :  { %3659 = vmatmul.mubr.msk.bf16.vlgmr.msra.gmra.mrb[88].mxu0 %vm33_vm0, %v2136_v43 }
0x2690   :  { %3671 = vmatpush3.bf16.msra.mxu0 %v3944_v4  ;;  %3672 = vmatprep.mubr.msk.bf16.mxu0 %vm3888_vm1, %v3887_v3 }
0x2691   :  { %3684 = vmatprep.subr.bf16.mxu0 %v3887_v3 }
0x2762   :  { %v2174_v44 = vpop.f32.mrb[88].mxu0 }
0x2763   :  { %v2175_v45 = vadd.f32 %v4308_v21, %v2174_v44  ;;  %v3660_v47 = vpop.f32.mrb[89].mxu0 }
0x2764   :  { %v2177_v48 = vpop.f32.mrb[90].mxu0 }
0x2765   :  { %3850 = vtanh.f32 %v2175_v45  ;;  %v3661_v49 = vpop.f32.mrb[91].mxu0 }
0x276f   :  { %v3851_v34 = vpop.eup %3850 }
0x2770   :  { %v2181_v50 = vpack.c.bf16 %v3851_v34, %v3851_v34 }
0x2772   :  { %3667 = vmatmul.mubr.msk.bf16.vlgmr.msra.gmra.mrb[88].mxu1 %vm138_vm2, %v2181_v50 }
0x2773   :  { %3677 = vmatpush3.bf16.msra.mxu1 %v3969_v9  ;;  %3680 = vmatprep.mubr.msk.bf16.mxu1 %vm3888_vm1, %v3887_v3 }
0x2774   :  { %3678 = vmatprep.subr.bf16.mxu1 %v3887_v3 }
0x2777   :  { %3679 = vmatpush3.bf16.msra.mxu1 %v3979_v12 }
0x2778   :  { %3690 = vmatprep.subr.bf16.mxu1 %v3887_v3 }
0x2845   :  { %v2219_v52 = vpop.f32.mrb[88].mxu1 }
0x2846   :  { %v2220_v54 = vadd.f32 %v4322_v42, %v2219_v52  ;;  %v3668_v55 = vpop.f32.mrb[89].mxu1 }
0x2847   :  { %v2222_v56 = vpop.f32.mrb[90].mxu1 }
0x2848   :  { %v2226_v59 = vmul.f32 %v2225_v53, %v2220_v54  ;;  %v2319_v60 = vmul.f32 2.0, %v2220_v54  ;;  %v3669_v46 = vpop.f32.mrb[91].mxu1 }
0x284a   :  { %v2227_v61 = vadd.f32 %v2226_v59, %v4342_v7  ;;  %v2320_v62 = vadd.f32 %v2319_v60, %v2318_v58 }
0x284c   :  { %v2228_v63 = vpack.c.bf16 %v2227_v61, %v2227_v61 }
0x284e   :  { %3673 = vmatmul.mubr.msk.bf16.vlgmr.msra.gmra.mrb[92].mxu0 %vm33_vm0, %v2228_v63 }
0x284f   :  { %3685 = vmatpush3.bf16.msra.mxu0 %v3944_v4  ;;  %3686 = vmatprep.mubr.msk.bf16.mxu0 %vm3888_vm1, %v3887_v3 }
0x2850   :  { %3698 = vmatprep.subr.bf16.mxu0 %v3887_v3 }
0x2921   :  { %v2266_v0 = vpop.f32.mrb[92].mxu0 }
0x2922   :  { %v2267_v1 = vadd.f32 %v4308_v21, %v2266_v0  ;;  %v3674_v2 = vpop.f32.mrb[93].mxu0  ;;  %v2597_v0 = vstv %s4430_s14 }
0x2923   :  { %v2269_v6 = vpop.f32.mrb[94].mxu0 }
0x2924   :  { %3852 = vtanh.f32 %v2267_v1  ;;  %v3675_v8 = vpop.f32.mrb[95].mxu0 }
0x292e   :  { %v3853_v10 = vpop.eup %3852 }
0x292f   :  { %v2273_v11 = vpack.c.bf16 %v3853_v10, %v3853_v10 }
0x2931   :  { %3681 = vmatmul.mubr.msk.bf16.vlgmr.msra.gmra.mrb[92].mxu1 %vm138_vm2, %v2273_v11 }
0x2932   :  { %3691 = vmatpush3.bf16.msra.mxu1 %v3969_v9  ;;  %3694 = vmatprep.mubr.msk.bf16.mxu1 %vm3888_vm1, %v3887_v3 }
0x2933   :  { %3692 = vmatprep.subr.bf16.mxu1 %v3887_v3 }
0x2936   :  { %3693 = vmatpush3.bf16.msra.mxu1 %v3979_v12 }
0x2937   :  { %3704 = vmatprep.subr.bf16.mxu1 %v3887_v3 }
0x2a04   :  { %v2311_v57 = vpop.f32.mrb[92].mxu1 }
0x2a05   :  { %v2312_v14 = vadd.f32 %v4322_v42, %v2311_v57  ;;  %v3682_v15 = vpop.f32.mrb[93].mxu1 }
0x2a06   :  { %v2314_v17 = vpop.f32.mrb[94].mxu1 }
0x2a07   :  { %v2321_v18 = vadd.f32 %v2320_v62, %v2312_v14  ;;  %v3683_v19 = vpop.f32.mrb[95].mxu1 }
0x2a09   :  { %v2323_v20 = vmul.f32 %v2322_v16, %v2321_v18 }
0x2a0b   :  { %v4412_v22 = vadd.f32 %v2323_v20, %v4342_v7 }
0x2a0d   :  { %3086 = vrot.lane.b32.xlu0 %v4412_v22, %s3893_s13  ;;  %v2325_v23 = vpack.c.bf16 %v4412_v22, %v4412_v22 }
0x2a0f   :  { %3687 = vmatmul.mubr.msk.bf16.vlgmr.msra.gmra.mrb[96].mxu0 %vm33_vm0, %v2325_v23 }
0x2a10   :  { %3699 = vmatpush3.bf16.msra.mxu0 %v3944_v4  ;;  %3700 = vmatprep.mubr.msk.bf16.mxu0 %vm3888_vm1, %v3887_v3 }
0x2a11   :  { %3712 = vmatprep.subr.bf16.mxu0 %v3887_v3 }
0x2ae2   :  { %v2363_v13 = vpop.f32.mrb[96].mxu0 }
0x2ae3   :  { %v2364_v25 = vadd.f32 %v4308_v21, %v2363_v13  ;;  %v3688_v7 = vpop.f32.mrb[97].mxu0 }
0x2ae4   :  { %v2366_v26 = vpop.f32.mrb[98].mxu0 }
0x2ae5   :  { %3854 = vtanh.f32 %v2364_v25  ;;  %v3689_v27 = vpop.f32.mrb[99].mxu0 }
0x2aef   :  { %v3855_v28 = vpop.eup %3854 }
0x2af0   :  { %v2370_v29 = vpack.c.bf16 %v3855_v28, %v3855_v28  ;;  %v2694_v28 = vstv %s62_s15 }
0x2af2   :  { %3695 = vmatmul.mubr.msk.bf16.vlgmr.msra.gmra.mrb[96].mxu1 %vm138_vm2, %v2370_v29 }
0x2af3   :  { %3705 = vmatpush3.bf16.msra.mxu1 %v3969_v9  ;;  %3708 = vmatprep.mubr.msk.bf16.mxu1 %vm3888_vm1, %v3887_v3 }
0x2af4   :  { %3706 = vmatprep.subr.bf16.mxu1 %v3887_v3 }
0x2af7   :  { %3707 = vmatpush3.bf16.msra.mxu1 %v3979_v12 }
0x2af8   :  { %3718 = vmatprep.subr.bf16.mxu1 %v3887_v3 }
0x2bc5   :  { %v2408_v5 = vpop.f32.mrb[96].mxu1 }
0x2bc6   :  { %v2409_v31 = vadd.f32 %v4322_v42, %v2408_v5  ;;  %v3696_v32 = vpop.f32.mrb[97].mxu1 }
0x2bc7   :  { %v2411_v33 = vpop.f32.mrb[98].mxu1 }
0x2bc8   :  { %v2415_v35 = vmul.f32 %v2414_v30, %v2409_v31  ;;  %v3697_v36 = vpop.f32.mrb[99].mxu1 }
0x2bca   :  { %v2416_v37 = vadd.f32 %v2415_v35, %v4412_v22 }
0x2bcc   :  { %v2417_v38 = vpack.c.bf16 %v2416_v37, %v2416_v37 }
0x2bce   :  { %3701 = vmatmul.mubr.msk.bf16.vlgmr.msra.gmra.mrb[100].mxu0 %vm33_vm0, %v2417_v38 }
0x2bcf   :  { %3713 = vmatpush3.bf16.msra.mxu0 %v3944_v4  ;;  %3714 = vmatprep.mubr.msk.bf16.mxu0 %vm3888_vm1, %v3887_v3 }
0x2bd0   :  { %3726 = vmatprep.subr.bf16.mxu0 %v3887_v3 }
0x2ca1   :  { %v2455_v39 = vpop.f32.mrb[100].mxu0 }
0x2ca2   :  { %v2456_v40 = vadd.f32 %v4308_v21, %v2455_v39  ;;  %v3702_v41 = vpop.f32.mrb[101].mxu0 }
0x2ca3   :  { %v2458_v43 = vpop.f32.mrb[102].mxu0 }
0x2ca4   :  { %3856 = vtanh.f32 %v2456_v40  ;;  %v3703_v44 = vpop.f32.mrb[103].mxu0  ;;  %v2786_v43 = vstv %s65_s18 }
0x2cae   :  { %v3857_v45 = vpop.eup %3856 }
0x2caf   :  { %v2462_v47 = vpack.c.bf16 %v3857_v45, %v3857_v45 }
0x2cb1   :  { %3709 = vmatmul.mubr.msk.bf16.vlgmr.msra.gmra.mrb[100].mxu1 %vm138_vm2, %v2462_v47 }
0x2cb2   :  { %3719 = vmatpush3.bf16.msra.mxu1 %v3969_v9  ;;  %3722 = vmatprep.mubr.msk.bf16.mxu1 %vm3888_vm1, %v3887_v3 }
0x2cb3   :  { %3720 = vmatprep.subr.bf16.mxu1 %v3887_v3 }
0x2cb6   :  { %3721 = vmatpush3.bf16.msra.mxu1 %v3979_v12 }
0x2cb7   :  { %3732 = vmatprep.subr.bf16.mxu1 %v3887_v3 }
0x2d84   :  { %v2500_v48 = vpop.f32.mrb[100].mxu1 }
0x2d85   :  { %v2501_v49 = vadd.f32 %v4322_v42, %v2500_v48  ;;  %v3710_v34 = vpop.f32.mrb[101].mxu1 }
0x2d86   :  { %v2503_v50 = vpop.f32.mrb[102].mxu1 }
0x2d87   :  { %v2506_v51 = vmul.f32 %v2501_v49, %v2414_v30  ;;  %v3711_v52 = vpop.f32.mrb[103].mxu1  ;;  %v2689_v62 = vmul.f32 2.0, %v2501_v49 }
0x2d89   :  { %v2507_v53 = vadd.f32 %v2506_v51, %v4412_v22  ;;  %v2690_v8 = vadd.f32 %v2689_v62, %v2409_v31 }
0x2d8b   :  { %v2508_v54 = vpack.c.bf16 %v2507_v53, %v2507_v53 }
0x2d8d   :  { %3715 = vmatmul.mubr.msk.bf16.vlgmr.msra.gmra.mrb[104].mxu0 %vm33_vm0, %v2508_v54 }
0x2d8e   :  { %3727 = vmatpush3.bf16.msra.mxu0 %v3944_v4  ;;  %3728 = vmatprep.mubr.msk.bf16.mxu0 %vm3888_vm1, %v3887_v3 }
0x2d8f   :  { %3740 = vmatprep.subr.bf16.mxu0 %v3887_v3 }
0x2e60   :  { %v2546_v55 = vpop.f32.mrb[104].mxu0 }
0x2e61   :  { %v2547_v56 = vadd.f32 %v4308_v21, %v2546_v55  ;;  %v3716_v58 = vpop.f32.mrb[105].mxu0 }
0x2e62   :  { %v2549_v59 = vpop.f32.mrb[106].mxu0 }
0x2e63   :  { %3858 = vtanh.f32 %v2547_v56  ;;  %v3717_v60 = vpop.f32.mrb[107].mxu0 }
0x2e6d   :  { %v3859_v46 = vpop.eup %3858 }
0x2e6e   :  { %v2553_v61 = vpack.c.bf16 %v3859_v46, %v3859_v46 }
0x2e70   :  { %3723 = vmatmul.mubr.msk.bf16.vlgmr.msra.gmra.mrb[104].mxu1 %vm138_vm2, %v2553_v61 }
0x2e71   :  { %3733 = vmatpush3.bf16.msra.mxu1 %v3969_v9  ;;  %3736 = vmatprep.mubr.msk.bf16.mxu1 %vm3888_vm1, %v3887_v3 }
0x2e72   :  { %3734 = vmatprep.subr.bf16.mxu1 %v3887_v3 }
0x2e75   :  { %3735 = vmatpush3.bf16.msra.mxu1 %v3979_v12 }
0x2e76   :  { %3746 = vmatprep.subr.bf16.mxu1 %v3887_v3 }
0x2f43   :  { %v2591_v63 = vpop.f32.mrb[104].mxu1 }
0x2f44   :  { %v2592_v1 = vadd.f32 %v4322_v42, %v2591_v63  ;;  %v3724_v2 = vpop.f32.mrb[105].mxu1 }
0x2f45   :  { %v2594_v6 = vpop.f32.mrb[106].mxu1 }
0x2f46   :  { %v2598_v10 = vmul.f32 %v2597_v0, %v2592_v1  ;;  %v2691_v11 = vmul.f32 2.0, %v2592_v1  ;;  %v3725_v57 = vpop.f32.mrb[107].mxu1 }
0x2f48   :  { %v2599_v14 = vadd.f32 %v2598_v10, %v4412_v22  ;;  %v2692_v15 = vadd.f32 %v2691_v11, %v2690_v8 }
0x2f4a   :  { %v2600_v16 = vpack.c.bf16 %v2599_v14, %v2599_v14 }
0x2f4c   :  { %3729 = vmatmul.mubr.msk.bf16.vlgmr.msra.gmra.mrb[108].mxu0 %vm33_vm0, %v2600_v16  ;;  %v2969_v16 = vstv %s4500_s17 }
0x2f4d   :  { %3741 = vmatpush3.bf16.msra.mxu0 %v3944_v4  ;;  %3742 = vmatprep.mubr.msk.bf16.mxu0 %vm3888_vm1, %v3887_v3 }
0x2f4e   :  { %3754 = vmatprep.subr.bf16.mxu0 %v3887_v3 }
0x301f   :  { %v2638_v17 = vpop.f32.mrb[108].mxu0 }
0x3020   :  { %v2639_v18 = vadd.f32 %v4308_v21, %v2638_v17  ;;  %v3730_v19 = vpop.f32.mrb[109].mxu0 }
0x3021   :  { %v2641_v20 = vpop.f32.mrb[110].mxu0 }
0x3022   :  { %3860 = vtanh.f32 %v2639_v18  ;;  %v3731_v23 = vpop.f32.mrb[111].mxu0 }
0x302c   :  { %v3861_v13 = vpop.eup %3860 }
0x302d   :  { %v2645_v25 = vpack.c.bf16 %v3861_v13, %v3861_v13 }
0x302f   :  { %3737 = vmatmul.mubr.msk.bf16.vlgmr.msra.gmra.mrb[108].mxu1 %vm138_vm2, %v2645_v25 }
0x3030   :  { %3747 = vmatpush3.bf16.msra.mxu1 %v3969_v9  ;;  %3750 = vmatprep.mubr.msk.bf16.mxu1 %vm3888_vm1, %v3887_v3 }
0x3031   :  { %3748 = vmatprep.subr.bf16.mxu1 %v3887_v3 }
0x3034   :  { %3749 = vmatpush3.bf16.msra.mxu1 %v3979_v12 }
0x3035   :  { %3760 = vmatprep.subr.bf16.mxu1 %v3887_v3 }
0x3102   :  { %v2683_v7 = vpop.f32.mrb[108].mxu1 }
0x3103   :  { %v2684_v26 = vadd.f32 %v4322_v42, %v2683_v7  ;;  %v3738_v27 = vpop.f32.mrb[109].mxu1 }
0x3104   :  { %v2686_v29 = vpop.f32.mrb[110].mxu1 }
0x3105   :  { %v2693_v5 = vadd.f32 %v2692_v15, %v2684_v26  ;;  %v3739_v30 = vpop.f32.mrb[111].mxu1 }
0x3107   :  { %v2695_v31 = vmul.f32 %v2694_v28, %v2693_v5 }
0x3109   :  { %v4482_v32 = vadd.f32 %v2695_v31, %v4412_v22 }
0x310b   :  { %3090 = vrot.lane.b32.xlu1 %v4482_v32, %s3894_s16  ;;  %v2697_v33 = vpack.c.bf16 %v4482_v32, %v4482_v32 }
0x310d   :  { %3743 = vmatmul.mubr.msk.bf16.vlgmr.msra.gmra.mrb[112].mxu0 %vm33_vm0, %v2697_v33 }
0x310e   :  { %3755 = vmatpush3.bf16.msra.mxu0 %v3944_v4  ;;  %3756 = vmatprep.mubr.msk.bf16.mxu0 %vm3888_vm1, %v3887_v3 }
0x310f   :  { %3768 = vmatprep.subr.bf16.mxu0 %v3887_v3 }
0x31e0   :  { %v2735_v35 = vpop.f32.mrb[112].mxu0 }
0x31e1   :  { %v2736_v36 = vadd.f32 %v4308_v21, %v2735_v35  ;;  %v3744_v22 = vpop.f32.mrb[113].mxu0 }
0x31e2   :  { %v2738_v37 = vpop.f32.mrb[114].mxu0 }
0x31e3   :  { %3862 = vtanh.f32 %v2736_v36  ;;  %v3745_v38 = vpop.f32.mrb[115].mxu0  ;;  %v3066_v36 = vstv %s66_s19 }
0x31ed   :  { %v3863_v39 = vpop.eup %3862 }
0x31ee   :  { %v2742_v40 = vpack.c.bf16 %v3863_v39, %v3863_v39 }
0x31f0   :  { %3751 = vmatmul.mubr.msk.bf16.vlgmr.msra.gmra.mrb[112].mxu1 %vm138_vm2, %v2742_v40  ;;  %v3071_v40 = vpop.permute.xlu0 %3070 }
0x31f1   :  { %3761 = vmatpush3.bf16.msra.mxu1 %v3969_v9  ;;  %3764 = vmatprep.mubr.msk.bf16.mxu1 %vm3888_vm1, %v3887_v3 }
0x31f2   :  { %3762 = vmatprep.subr.bf16.mxu1 %v3887_v3 }
0x31f5   :  { %3763 = vmatpush3.bf16.msra.mxu1 %v3979_v12 }
0x31f6   :  { %3774 = vmatprep.subr.bf16.mxu1 %v3887_v3 }
0x32c3   :  { %v2780_v41 = vpop.f32.mrb[112].mxu1 }
0x32c4   :  { %v2781_v44 = vadd.f32 %v4322_v42, %v2780_v41  ;;  %v3752_v45 = vpop.f32.mrb[113].mxu1  ;;  %v3079_v41 = vpop.permute.xlu1 %3078 }
0x32c5   :  { %v2783_v47 = vpop.f32.mrb[114].mxu1 }
0x32c6   :  { %v2787_v48 = vmul.f32 %v2786_v43, %v2781_v44  ;;  %v3753_v49 = vpop.f32.mrb[115].mxu1 }
0x32c8   :  { %v2788_v34 = vadd.f32 %v2787_v48, %v4482_v32 }
0x32ca   :  { %v2789_v50 = vpack.c.bf16 %v2788_v34, %v2788_v34 }
0x32cc   :  { %3757 = vmatmul.mubr.msk.bf16.vlgmr.msra.gmra.mrb[116].mxu0 %vm33_vm0, %v2789_v50 }
0x32cd   :  { %3769 = vmatpush3.bf16.msra.mxu0 %v3944_v4  ;;  %3770 = vmatprep.mubr.msk.bf16.mxu0 %vm3888_vm1, %v3887_v3 }
0x32ce   :  { %3782 = vmatprep.subr.bf16.mxu0 %v3887_v3 }
0x339f   :  { %v2827_v51 = vpop.f32.mrb[116].mxu0 }
0x33a0   :  { %v2828_v52 = vadd.f32 %v4308_v21, %v2827_v51  ;;  %v3758_v53 = vpop.f32.mrb[117].mxu0 }
0x33a1   :  { %v2830_v54 = vpop.f32.mrb[118].mxu0 }
0x33a2   :  { %3864 = vtanh.f32 %v2828_v52  ;;  %v3759_v55 = vpop.f32.mrb[119].mxu0 }
0x33ac   :  { %v3865_v56 = vpop.eup %3864 }
0x33ad   :  { %v2834_v58 = vpack.c.bf16 %v3865_v56, %v3865_v56 }
0x33af   :  { %3765 = vmatmul.mubr.msk.bf16.vlgmr.msra.gmra.mrb[116].mxu1 %vm138_vm2, %v2834_v58 }
0x33b0   :  { %3775 = vmatpush3.bf16.msra.mxu1 %v3969_v9  ;;  %3778 = vmatprep.mubr.msk.bf16.mxu1 %vm3888_vm1, %v3887_v3 }
0x33b1   :  { %3776 = vmatprep.subr.bf16.mxu1 %v3887_v3 }
0x33b4   :  { %3777 = vmatpush3.bf16.msra.mxu1 %v3979_v12 }
0x33b5   :  { %3788 = vmatprep.subr.bf16.mxu1 %v3887_v3 }
0x3482   :  { %v2872_v59 = vpop.f32.mrb[116].mxu1 }
0x3483   :  { %v2873_v60 = vadd.f32 %v4322_v42, %v2872_v59  ;;  %v3766_v46 = vpop.f32.mrb[117].mxu1 }
0x3484   :  { %v2875_v61 = vpop.f32.mrb[118].mxu1 }
0x3485   :  { %v2878_v62 = vmul.f32 %v2873_v60, %v2786_v43  ;;  %v3767_v63 = vpop.f32.mrb[119].mxu1  ;;  %v3075_v43 = vpop.permute.xlu0 %3074 }
0x3487   :  { %v2879_v0 = vadd.f32 %v2878_v62, %v4482_v32 }
0x3489   :  { %v2880_v1 = vpack.c.bf16 %v2879_v0, %v2879_v0  ;;  %v3087_v47 = vpop.permute.xlu0 %3086 }
0x348b   :  { %3771 = vmatmul.mubr.msk.bf16.vlgmr.msra.gmra.mrb[120].mxu0 %vm33_vm0, %v2880_v1 }
0x348c   :  { %3783 = vmatpush3.bf16.msra.mxu0 %v3944_v4  ;;  %3784 = vmatprep.mubr.msk.bf16.mxu0 %vm3888_vm1, %v3887_v3  ;;  %v3061_v4 = vmul.f32 2.0, %v2873_v60 }
0x348e   :  { %v3062_v20 = vadd.f32 %v3061_v4, %v2781_v44  ;;  %v3083_v44 = vpop.permute.xlu1 %3082 }
0x355e   :  { %v2918_v2 = vpop.f32.mrb[120].mxu0 }
0x355f   :  { %v2919_v6 = vadd.f32 %v4308_v21, %v2918_v2  ;;  %v3772_v8 = vpop.f32.mrb[121].mxu0 }
0x3560   :  { %v2921_v10 = vpop.f32.mrb[122].mxu0 }
0x3561   :  { %3866 = vtanh.f32 %v2919_v6  ;;  %v3773_v11 = vpop.f32.mrb[123].mxu0 }
0x356b   :  { %v3867_v57 = vpop.eup %3866 }
0x356c   :  { %v2925_v14 = vpack.c.bf16 %v3867_v57, %v3867_v57 }
0x356e   :  { %3779 = vmatmul.mubr.msk.bf16.vlgmr.msra.gmra.mrb[120].mxu1 %vm138_vm2, %v2925_v14 }
0x356f   :  { %3789 = vmatpush3.bf16.msra.mxu1 %v3969_v9  ;;  %3792 = vmatprep.mubr.msk.bf16.mxu1 %vm3888_vm1, %v3887_v3 }
0x3570   :  { %3790 = vmatprep.subr.bf16.mxu1 %v3887_v3 }
0x3573   :  { %3791 = vmatpush3.bf16.msra.mxu1 %v3979_v12 }
0x3641   :  { %v2963_v15 = vpop.f32.mrb[120].mxu1 }
0x3642   :  { %v2964_v17 = vadd.f32 %v4322_v42, %v2963_v15  ;;  %v3780_v18 = vpop.f32.mrb[121].mxu1 }
0x3643   :  { %v2966_v19 = vpop.f32.mrb[122].mxu1 }
0x3644   :  { %v2970_v23 = vmul.f32 %v2969_v16, %v2964_v17  ;;  %v3063_v13 = vmul.f32 2.0, %v2964_v17  ;;  %v3781_v25 = vpop.f32.mrb[123].mxu1 }
0x3646   :  { %v2971_v9 = vadd.f32 %v2970_v23, %v4482_v32  ;;  %v3064_v7 = vadd.f32 %v3063_v13, %v3062_v20 }
0x3648   :  { %v2972_v26 = vpack.c.bf16 %v2971_v9, %v2971_v9 }
0x364a   :  { %3785 = vmatmul.mubr.msk.bf16.vlgmr.msra.gmra.mrb[124].mxu0 %vm33_vm0, %v2972_v26 }
0x371d   :  { %v3010_v3 = vpop.f32.mrb[124].mxu0 }
0x371e   :  { %v3011_v12 = vadd.f32 %v4308_v21, %v3010_v3  ;;  %v3786_v27 = vpop.f32.mrb[125].mxu0 }
0x371f   :  { %v3013_v28 = vpop.f32.mrb[126].mxu0 }
0x3720   :  { %3868 = vtanh.f32 %v3011_v12  ;;  %v3787_v29 = vpop.f32.mrb[127].mxu0 }
0x372a   :  { %v3869_v5 = vpop.eup %3868 }
0x372b   :  { %v3017_v30 = vpack.c.bf16 %v3869_v5, %v3869_v5 }
0x372d   :  { %3793 = vmatmul.mubr.msk.bf16.vlgmr.msra.gmra.mrb[124].mxu1 %vm138_vm2, %v3017_v30 }
0x3800   :  { %v3055_v31 = vpop.f32.mrb[124].mxu1 }
0x3801   :  { %v3056_v33 = vadd.f32 %v4322_v42, %v3055_v31  ;;  %v3794_v35 = vpop.f32.mrb[125].mxu1  ;;  %v3097_v42 = vsel %vm33_vm0, %v4053_v24, %v3071_v40 }
0x3802   :  { %v3058_v22 = vpop.f32.mrb[126].mxu1  ;;  %v3098_v45 = vsel %vm138_vm2, %v3097_v42, %v3075_v43 }
0x3803   :  { %v3065_v37 = vadd.f32 %v3064_v7, %v3056_v33  ;;  %v3795_v38 = vpop.f32.mrb[127].mxu1  ;;  %v3100_v48 = vsel %vm3099_vm3, %v3098_v45, %v3079_v41 }
0x3804   :  { %v3102_v49 = vsel %vm3101_vm4, %v3100_v48, %v3083_v44 }
0x3805   :  { %v3067_v39 = vmul.f32 %v3066_v36, %v3065_v37  ;;  %v3104_v34 = vsel %vm3103_vm5, %v3102_v49, %v3087_v47 }
0x3807   :  { %v3068_v21 = vadd.f32 %v3067_v39, %v4482_v32  ;;  %v3091_v32 = vpop.permute.xlu1 %3090 }
0x3808   :  { %v3106_v50 = vsel %vm3105_vm6, %v3104_v34, %v3091_v32 }
0x3809   :  { %3094 = vrot.lane.b32.xlu0 %v3068_v21, %s3895_s20  ;;  %3110 = vst.msk [vmem:[#allocation2] sm:$0xff] %vm33_vm0, %v3068_v21 }
0x387b   :  { %v3095_v51 = vpop.permute.xlu0 %3094 }
0x387c   :  { %v3108_v52 = vsel %vm3107_vm7, %v3106_v50, %v3095_v51 }
0x387d   :  { %3109 = vst [vmem:[%s4553_s6] sm:$0xff] %v3108_v52 }

</bundles_post_ra>
